<compile_context>
chip_gen: v5e
topology: v5e:2x2
jax: 0.10.0
libtpu: 0.0.40
codegen_flags: <defaults>
</compile_context>

<pallas_src>
import functools

import jax
import jax.numpy as jnp
from jax.experimental import pallas as pl
from jax.experimental.pallas import tpu as pltpu

EPS = 1e-5                  # nn.BatchNorm1d default eps
NEG_SLOPE = 0.01            # nn.LeakyReLU default negative_slope
COMPUTE_DT = jnp.bfloat16   # MXU-native operand dtype; accumulation stays f32


def _round_up(x, m):
    return (x + m - 1) // m * m


def _leaky_relu(h):
    # max(h, a*h) == LeakyReLU(h) for 0 < a < 1: single VALU op.
    return jnp.maximum(h, NEG_SLOPE * h)


def mlp_gnn_kernel(n_fc,
                   # inputs
                   x_ref, w0_ref, b0_ref, fc_w_ref, fc_b_ref,
                   hs_ref, ht_ref, hw_ref, hb_ref,
                   # output (both heads fused into one lane-padded slab)
                   y_ref):
    # First linear (BN of the first hidden FC block is folded in on the host).
    h = jnp.dot(x_ref[...].astype(COMPUTE_DT), w0_ref[...],
                preferred_element_type=jnp.float32) + b0_ref[...]

    # Hidden FC layers; after host-side BN folding each is LeakyReLU -> Linear.
    def body(i, h):
        a = _leaky_relu(h).astype(COMPUTE_DT)
        return (jnp.dot(a, fc_w_ref[i], preferred_element_type=jnp.float32)
                + fc_b_ref[pl.ds(i, 1), :])

    if n_fc > 0:
        h = jax.lax.fori_loop(0, n_fc, body, h, unroll=(n_fc <= 4))

    # Heads: per-head BN scale/shift + LeakyReLU (VPU, f32), then ONE fused
    # block-diagonal matmul (K = 2*hid) writing a single lane-dense slab.
    a_out = _leaky_relu(h * hs_ref[0:1, :] + ht_ref[0:1, :])
    a_inf = _leaky_relu(h * hs_ref[1:2, :] + ht_ref[1:2, :])
    a = jnp.concatenate([a_out, a_inf], axis=-1).astype(COMPUTE_DT)
    y = jnp.dot(a, hw_ref[...], preferred_element_type=jnp.float32) + hb_ref[...]
    y_ref[...] = y.astype(y_ref.dtype)


def _pick_block_n(n_rows):
    """Row-tile size: >= 2 grid steps when possible (v7x has 2 TensorCores),
    capped at 1024 rows, multiple of 16."""
    bn = min(1024, _round_up(max(pl.cdiv(n_rows, 2), 1), 16))
    return max(bn, 16)


def mlp_gnn_forward(x, params, *, block_n=None):
    """Fused MLP_GNN forward.  x: [N, in_dim] float32 -> (y_out, y_inf)."""
    N, in_dim = x.shape
    w0 = params["w0"]
    hid = w0.shape[1]
    out_dim = params["out_w"].shape[1]
    n_fc = params["fc_w"].shape[0]
    head_pad = _round_up(2 * out_dim, 128)   # single fused head output slab
    f32 = jnp.float32

    # ---- host-side preprocessing (exact eval-mode BN folding, in f32) ------
    if n_fc > 0:
        fc_scale = params["fc_g"] * jax.lax.rsqrt(params["fc_v"] + EPS)  # (n_fc, hid)
        fc_shift = params["fc_be"] - params["fc_m"] * fc_scale
        w_chain = [w0] + [params["fc_w"][i] for i in range(n_fc)]
        b_chain = [params["b0"][0]] + [params["fc_b"][i] for i in range(n_fc)]
        for i in range(n_fc):     # BN of FC block i folds into chain linear i
            w_chain[i] = w_chain[i] * fc_scale[i][None, :]
            b_chain[i] = b_chain[i] * fc_scale[i] + fc_shift[i]
        w0_f = w_chain[0].astype(COMPUTE_DT)
        b0_f = b_chain[0][None, :].astype(f32)
        fc_w_f = jnp.stack(w_chain[1:]).astype(COMPUTE_DT)     # (n_fc, hid, hid)
        fc_b_f = jnp.stack(b_chain[1:]).astype(f32)            # (n_fc, hid)
    else:
        w0_f = w0.astype(COMPUTE_DT)
        b0_f = params["b0"].astype(f32)
        fc_w_f = jnp.zeros((1, hid, hid), COMPUTE_DT)          # dummy, loop skipped
        fc_b_f = jnp.zeros((1, hid), f32)

    # Head BN -> precomputed scale/shift (applied in-kernel).  Both head
    # Linears are packed into ONE block-diagonal (2*hid, head_pad) weight so a
    # single matmul produces both heads' outputs side by side.
    def head_scale_shift(g, be, m, v):
        s = g * jax.lax.rsqrt(v + EPS)
        return s[0], (be - m * s)[0]                           # (hid,), (hid,)

    so, to = head_scale_shift(params["out_g"], params["out_be"],
                              params["out_m"], params["out_v"])
    si, ti = head_scale_shift(params["inf_g"], params["inf_be"],
                              params["inf_m"], params["inf_v"])
    hs = jnp.stack([so, si]).astype(f32)                       # (2, hid)
    ht = jnp.stack([to, ti]).astype(f32)                       # (2, hid)
    hw = jnp.zeros((2 * hid, head_pad), f32)
    hw = hw.at[:hid, :out_dim].set(params["out_w"])
    hw = hw.at[hid:, out_dim:2 * out_dim].set(params["inf_w"])
    hw = hw.astype(COMPUTE_DT)
    hb = jnp.zeros((1, head_pad), f32)
    hb = hb.at[0, :out_dim].set(params["out_b"][0])
    hb = hb.at[0, out_dim:2 * out_dim].set(params["inf_b"][0])

    weight_args = [w0_f, b0_f, fc_w_f, fc_b_f, hs, ht, hw, hb]

    # ---- row tiling ---------------------------------------------------------
    if block_n is None:
        block_n = _pick_block_n(N)
    assert block_n % 8 == 0 and block_n >= 8
    n_pad = _round_up(max(N, block_n), block_n)
    if n_pad != N:
        x = jnp.pad(x, ((0, n_pad - N), (0, 0)))
    x = x.astype(f32)
    grid = (n_pad // block_n,)

    kernel = functools.partial(mlp_gnn_kernel, n_fc)

    def run(single_buffer_weights):
        def wspec(a):
            kw = {"pipeline_mode": pl.Buffered(1)} if single_buffer_weights else {}
            return pl.BlockSpec(a.shape, lambda i, nd=a.ndim: (0,) * nd, **kw)

        # VMEM budget: resident weights (x buffer count) + double-buffered x/y
        # row tiles + live activations + headroom, capped below the physical
        # per-core VMEM (85% leaves compiler scratch headroom on v7x too).
        wbuf = 1 if single_buffer_weights else 2
        weight_bytes = wbuf * sum(int(a.size) * a.dtype.itemsize
                                  for a in weight_args)
        io_bytes = 2 * block_n * in_dim * 4 + 2 * block_n * head_pad * 4
        live_bytes = 8 * block_n * max(hid, head_pad) * 4
        try:
            vmem_cap = int(pltpu.get_tpu_info().vmem_capacity_bytes)
        except Exception:
            vmem_cap = 64 << 20
        vmem_limit = int(min(max(weight_bytes + io_bytes + live_bytes + (8 << 20),
                                 32 << 20),
                             int(0.85 * vmem_cap)))

        return pl.pallas_call(
            kernel,
            out_shape=jax.ShapeDtypeStruct((n_pad, head_pad), jnp.float32),
            grid=grid,
            in_specs=[pl.BlockSpec((block_n, in_dim), lambda i: (i, 0))]
                     + [wspec(a) for a in weight_args],
            out_specs=pl.BlockSpec((block_n, head_pad), lambda i: (i, 0)),
            compiler_params=pltpu.CompilerParams(
                dimension_semantics=("parallel",),
                vmem_limit_bytes=vmem_limit),
        )(x, *weight_args)

    try:
        y = run(True)           # single-buffered resident weights
    except Exception:
        y = run(False)          # fallback: default double-buffered specs

    y_out = y[:N, :out_dim]
    y_inf = y[:N, out_dim:2 * out_dim]
    return y_out, y_inf


def init_params(key, in_dim, hid_dim, out_dim, n_layers):
    """Deterministic synthetic parameters (shapes match the PyTorch module).
    BN running stats / affine params are randomized so the host-side folding
    is actually exercised by the correctness check."""
    n_fc = n_layers - 1
    keys = jax.random.split(key, 16)

    def lin(k, di, do):
        scale = 1.0 / jnp.sqrt(di)
        return jax.random.uniform(k, (di, do), jnp.float32, -scale, scale)

    def bn(kg, kb, km, kv, rows):
        g = jax.random.uniform(kg, (rows, hid_dim), jnp.float32, 0.5, 1.5)
        be = 0.5 * jax.random.normal(kb, (rows, hid_dim), jnp.float32)
        m = 0.5 * jax.random.normal(km, (rows, hid_dim), jnp.float32)
        v = jax.random.uniform(kv, (rows, hid_dim), jnp.float32, 0.5, 1.5)
        return g, be, m, v

    fg, fbe, fm, fv = bn(keys[4], keys[5], keys[6], keys[7], max(n_fc, 1))
    og, obe, om, ov = bn(keys[8], keys[9], keys[10], keys[11], 1)
    ig, ibe, im, iv = bn(keys[12], keys[13], keys[14], keys[15], 1)

    p = {
        "w0": lin(keys[0], in_dim, hid_dim),
        "b0": 0.1 * jax.random.normal(keys[1], (1, hid_dim), jnp.float32),
        "fc_w": jnp.stack([lin(k, hid_dim, hid_dim)
                           for k in jax.random.split(keys[2], max(n_fc, 1))])[:n_fc],
        "fc_b": 0.1 * jax.random.normal(keys[3], (max(n_fc, 1), hid_dim),
                                        jnp.float32)[:n_fc],
        "fc_g": fg[:n_fc], "fc_be": fbe[:n_fc], "fc_m": fm[:n_fc], "fc_v": fv[:n_fc],
        "out_g": og, "out_be": obe, "out_m": om, "out_v": ov,
        "out_w": lin(jax.random.fold_in(keys[0], 1), hid_dim, out_dim),
        "out_b": 0.1 * jax.random.normal(jax.random.fold_in(keys[1], 1),
                                         (1, out_dim), jnp.float32),
        "inf_g": ig, "inf_be": ibe, "inf_m": im, "inf_v": iv,
        "inf_w": lin(jax.random.fold_in(keys[0], 2), hid_dim, out_dim),
        "inf_b": 0.1 * jax.random.normal(jax.random.fold_in(keys[1], 2),
                                         (1, out_dim), jnp.float32),
    }
    return p


def reference_forward(x, params):
    """Plain-JAX reference using the ORIGINAL (unfolded) module parameters."""
    def fc(h, g, be, m, v, w, b):
        h = (h - m) * jax.lax.rsqrt(v + EPS) * g + be
        h = jnp.where(h > 0, h, NEG_SLOPE * h)
        return h @ w + b

    h = x @ params["w0"] + params["b0"]
    for i in range(params["fc_w"].shape[0]):
        h = fc(h, params["fc_g"][i], params["fc_be"][i],
               params["fc_m"][i], params["fc_v"][i],
               params["fc_w"][i], params["fc_b"][i])
    y_out = fc(h, params["out_g"], params["out_be"], params["out_m"],
               params["out_v"], params["out_w"], params["out_b"])
    y_inf = fc(h, params["inf_g"], params["inf_be"], params["inf_m"],
               params["inf_v"], params["inf_w"], params["inf_b"])
    return y_out, y_inf


if __name__ == "__main__":
    # N deliberately not a tile multiple (exercises the row-padding path);
    # hid=128 keeps the matmuls MXU-shaped; auto block_n gives a 2-step grid.
    N, in_dim, hid_dim, out_dim = 200, 16, 128, 4
    param = {"n_layers": 3, "dropout": 0.5}   # dropout is identity in eval mode

    key = jax.random.PRNGKey(0)
    kx, kp = jax.random.split(key)
    x = jax.random.normal(kx, (N, in_dim), jnp.float32)
    params = init_params(kp, in_dim, hid_dim, out_dim, param["n_layers"])

    y_out, y_inf = mlp_gnn_forward(x, params)
    jax.block_until_ready((y_out, y_inf))

    ref_out, ref_inf = reference_forward(x, params)
    assert y_out.shape == ref_out.shape and y_inf.shape == ref_inf.shape

    # BN folding re-orders float ops and matmul operands are bf16 on the MXU
    # (f32 accumulation), so compare with a relative-to-max-magnitude
    # tolerance; structural bugs show up as O(1) errors because the synthetic
    # BN stats are randomized.
    def check(a, b):
        tol = 5e-2 * (float(jnp.max(jnp.abs(b))) + 1e-6)
        err = float(jnp.max(jnp.abs(a - b)))
        assert err < tol, (err, tol)

    check(y_out, ref_out)
    check(y_inf, ref_inf)

    print("KERNEL_OK")
</pallas_src>

<mosaic_0001>
module attributes {stable_mosaic.version = 11 : i64} {
  func.func @mlp_gnn_kernel(%arg0: i32, %arg1: memref<112x16xf32, #tpu.memory_space<vmem>>, %arg2: memref<16x128xbf16, #tpu.memory_space<vmem>>, %arg3: memref<1x128xf32, #tpu.memory_space<vmem>>, %arg4: memref<2x128x128xbf16, #tpu.memory_space<vmem>>, %arg5: memref<2x128xf32, #tpu.memory_space<vmem>>, %arg6: memref<2x128xf32, #tpu.memory_space<vmem>>, %arg7: memref<2x128xf32, #tpu.memory_space<vmem>>, %arg8: memref<256x128xbf16, #tpu.memory_space<vmem>>, %arg9: memref<1x128xf32, #tpu.memory_space<vmem>>, %arg10: memref<112x128xf32, #tpu.memory_space<vmem>>) attributes {dimension_semantics = [#tpu.dimension_semantics<parallel>], iteration_bounds = array<i64: 2>, scalar_prefetch = 0 : i64, scratch_operands = 0 : i64, tpu.core_type = #tpu.core_type<tc>, window_params = [{transform_indices = @transform_0, window_bounds = array<i64: 112, 16>}, {pipeline_mode = #tpu.pipeline_mode<synchronous>, transform_indices = @transform_1, window_bounds = array<i64: 16, 128>}, {pipeline_mode = #tpu.pipeline_mode<synchronous>, transform_indices = @transform_2, window_bounds = array<i64: 1, 128>}, {pipeline_mode = #tpu.pipeline_mode<synchronous>, transform_indices = @transform_3, window_bounds = array<i64: 2, 128, 128>}, {pipeline_mode = #tpu.pipeline_mode<synchronous>, transform_indices = @transform_4, window_bounds = array<i64: 2, 128>}, {pipeline_mode = #tpu.pipeline_mode<synchronous>, transform_indices = @transform_5, window_bounds = array<i64: 2, 128>}, {pipeline_mode = #tpu.pipeline_mode<synchronous>, transform_indices = @transform_6, window_bounds = array<i64: 2, 128>}, {pipeline_mode = #tpu.pipeline_mode<synchronous>, transform_indices = @transform_7, window_bounds = array<i64: 256, 128>}, {pipeline_mode = #tpu.pipeline_mode<synchronous>, transform_indices = @transform_8, window_bounds = array<i64: 1, 128>}, {transform_indices = @transform_9, window_bounds = array<i64: 112, 128>}]} {
    %c0 = arith.constant 0 : index
    %c0_0 = arith.constant 0 : index
    %0 = vector.load %arg1[%c0, %c0_0] : memref<112x16xf32, #tpu.memory_space<vmem>>, vector<112x16xf32>
    %1 = arith.truncf %0 : vector<112x16xf32> to vector<112x16xbf16>
    %c0_1 = arith.constant 0 : index
    %c0_2 = arith.constant 0 : index
    %2 = vector.load %arg2[%c0_1, %c0_2] : memref<16x128xbf16, #tpu.memory_space<vmem>>, vector<16x128xbf16>
    %cst = arith.constant dense<0.000000e+00> : vector<112x128xf32>
    %3 = tpu.matmul %1, %2, %cst {dimension_numbers = #tpu.dot_dimension_numbers<[1], [0], [0], [1], [0, 0, 1, 1], [], []>} : vector<112x16xbf16>, vector<16x128xbf16>, vector<112x128xf32> -> vector<112x128xf32>
    %c0_3 = arith.constant 0 : index
    %c0_4 = arith.constant 0 : index
    %4 = vector.load %arg3[%c0_3, %c0_4] : memref<1x128xf32, #tpu.memory_space<vmem>>, vector<1x128xf32>
    %5 = vector.broadcast %4 : vector<1x128xf32> to vector<112x128xf32>
    %6 = arith.addf %3, %5 : vector<112x128xf32>
    %c0_i32 = arith.constant 0 : i32
    %cst_5 = arith.constant 0.00999999977 : f32
    %7 = vector.broadcast %cst_5 : f32 to vector<112x128xf32>
    %8 = arith.mulf %7, %6 : vector<112x128xf32>
    %9 = arith.maximumf %6, %8 : vector<112x128xf32>
    %10 = arith.truncf %9 : vector<112x128xf32> to vector<112x128xbf16>
    %11 = arith.index_cast %c0_i32 : i32 to index
    %c0_6 = arith.constant 0 : index
    %c0_7 = arith.constant 0 : index
    %12 = vector.load %arg4[%11, %c0_6, %c0_7] : memref<2x128x128xbf16, #tpu.memory_space<vmem>>, vector<1x128x128xbf16>
    %13 = vector.shape_cast %12 : vector<1x128x128xbf16> to vector<128x128xbf16>
    %cst_8 = arith.constant dense<0.000000e+00> : vector<112x128xf32>
    %14 = tpu.matmul %10, %13, %cst_8 {dimension_numbers = #tpu.dot_dimension_numbers<[1], [0], [0], [1], [0, 0, 1, 1], [], []>} : vector<112x128xbf16>, vector<128x128xbf16>, vector<112x128xf32> -> vector<112x128xf32>
    %15 = arith.index_cast %c0_i32 : i32 to index
    %c0_9 = arith.constant 0 : index
    %16 = vector.load %arg5[%15, %c0_9] : memref<2x128xf32, #tpu.memory_space<vmem>>, vector<1x128xf32>
    %17 = vector.broadcast %16 : vector<1x128xf32> to vector<112x128xf32>
    %18 = arith.addf %14, %17 : vector<112x128xf32>
    %c1_i32 = arith.constant 1 : i32
    %cst_10 = arith.constant 0.00999999977 : f32
    %19 = vector.broadcast %cst_10 : f32 to vector<112x128xf32>
    %20 = arith.mulf %19, %18 : vector<112x128xf32>
    %21 = arith.maximumf %18, %20 : vector<112x128xf32>
    %22 = arith.truncf %21 : vector<112x128xf32> to vector<112x128xbf16>
    %23 = arith.index_cast %c1_i32 : i32 to index
    %c0_11 = arith.constant 0 : index
    %c0_12 = arith.constant 0 : index
    %24 = vector.load %arg4[%23, %c0_11, %c0_12] : memref<2x128x128xbf16, #tpu.memory_space<vmem>>, vector<1x128x128xbf16>
    %25 = vector.shape_cast %24 : vector<1x128x128xbf16> to vector<128x128xbf16>
    %cst_13 = arith.constant dense<0.000000e+00> : vector<112x128xf32>
    %26 = tpu.matmul %22, %25, %cst_13 {dimension_numbers = #tpu.dot_dimension_numbers<[1], [0], [0], [1], [0, 0, 1, 1], [], []>} : vector<112x128xbf16>, vector<128x128xbf16>, vector<112x128xf32> -> vector<112x128xf32>
    %27 = arith.index_cast %c1_i32 : i32 to index
    %c0_14 = arith.constant 0 : index
    %28 = vector.load %arg5[%27, %c0_14] : memref<2x128xf32, #tpu.memory_space<vmem>>, vector<1x128xf32>
    %29 = vector.broadcast %28 : vector<1x128xf32> to vector<112x128xf32>
    %30 = arith.addf %26, %29 : vector<112x128xf32>
    %c2_i32 = arith.constant 2 : i32
    %c0_15 = arith.constant 0 : index
    %c0_16 = arith.constant 0 : index
    %31 = vector.load %arg6[%c0_15, %c0_16] : memref<2x128xf32, #tpu.memory_space<vmem>>, vector<1x128xf32>
    %32 = vector.broadcast %31 : vector<1x128xf32> to vector<112x128xf32>
    %33 = arith.mulf %30, %32 : vector<112x128xf32>
    %c0_17 = arith.constant 0 : index
    %c0_18 = arith.constant 0 : index
    %34 = vector.load %arg7[%c0_17, %c0_18] : memref<2x128xf32, #tpu.memory_space<vmem>>, vector<1x128xf32>
    %35 = vector.broadcast %34 : vector<1x128xf32> to vector<112x128xf32>
    %36 = arith.addf %33, %35 : vector<112x128xf32>
    %cst_19 = arith.constant 0.00999999977 : f32
    %37 = vector.broadcast %cst_19 : f32 to vector<112x128xf32>
    %38 = arith.mulf %37, %36 : vector<112x128xf32>
    %39 = arith.maximumf %36, %38 : vector<112x128xf32>
    %c1 = arith.constant 1 : index
    %c0_20 = arith.constant 0 : index
    %40 = vector.load %arg6[%c1, %c0_20] : memref<2x128xf32, #tpu.memory_space<vmem>>, vector<1x128xf32>
    %41 = vector.broadcast %40 : vector<1x128xf32> to vector<112x128xf32>
    %42 = arith.mulf %30, %41 : vector<112x128xf32>
    %c1_21 = arith.constant 1 : index
    %c0_22 = arith.constant 0 : index
    %43 = vector.load %arg7[%c1_21, %c0_22] : memref<2x128xf32, #tpu.memory_space<vmem>>, vector<1x128xf32>
    %44 = vector.broadcast %43 : vector<1x128xf32> to vector<112x128xf32>
    %45 = arith.addf %42, %44 : vector<112x128xf32>
    %cst_23 = arith.constant 0.00999999977 : f32
    %46 = vector.broadcast %cst_23 : f32 to vector<112x128xf32>
    %47 = arith.mulf %46, %45 : vector<112x128xf32>
    %48 = arith.maximumf %45, %47 : vector<112x128xf32>
    %49 = tpu.concatenate %39, %48 in 1 : vector<112x128xf32>, vector<112x128xf32> -> vector<112x256xf32>
    %50 = arith.truncf %49 : vector<112x256xf32> to vector<112x256xbf16>
    %c0_24 = arith.constant 0 : index
    %c0_25 = arith.constant 0 : index
    %51 = vector.load %arg8[%c0_24, %c0_25] : memref<256x128xbf16, #tpu.memory_space<vmem>>, vector<256x128xbf16>
    %cst_26 = arith.constant dense<0.000000e+00> : vector<112x128xf32>
    %52 = tpu.matmul %50, %51, %cst_26 {dimension_numbers = #tpu.dot_dimension_numbers<[1], [0], [0], [1], [0, 0, 1, 1], [], []>} : vector<112x256xbf16>, vector<256x128xbf16>, vector<112x128xf32> -> vector<112x128xf32>
    %c0_27 = arith.constant 0 : index
    %c0_28 = arith.constant 0 : index
    %53 = vector.load %arg9[%c0_27, %c0_28] : memref<1x128xf32, #tpu.memory_space<vmem>>, vector<1x128xf32>
    %54 = vector.broadcast %53 : vector<1x128xf32> to vector<112x128xf32>
    %55 = arith.addf %52, %54 : vector<112x128xf32>
    %c0_29 = arith.constant 0 : index
    %c0_30 = arith.constant 0 : index
    %56 = vector.load %arg10[%c0_29, %c0_30] : memref<112x128xf32, #tpu.memory_space<vmem>>, vector<112x128xf32>
    tpu.vector_store %arg10[%c0_29, %c0_30], %55 {strides = array<i32>} : memref<112x128xf32, #tpu.memory_space<vmem>>, vector<112x128xf32>,
    return
  }
  func.func @transform_0(%arg0: i32) -> (i32, i32) {
    %c0_i32 = arith.constant 0 : i32
    %c0_i32_0 = arith.constant 0 : i32
    return %arg0, %c0_i32 : i32, i32
  }
  func.func @transform_1(%arg0: i32) -> (i32, i32) {
    %c0_i32 = arith.constant 0 : i32
    %c0_i32_0 = arith.constant 0 : i32
    %c0_i32_1 = arith.constant 0 : i32
    return %c0_i32, %c0_i32_0 : i32, i32
  }
  func.func @transform_2(%arg0: i32) -> (i32, i32) {
    %c0_i32 = arith.constant 0 : i32
    %c0_i32_0 = arith.constant 0 : i32
    %c0_i32_1 = arith.constant 0 : i32
    return %c0_i32, %c0_i32_0 : i32, i32
  }
  func.func @transform_3(%arg0: i32) -> (i32, i32, i32) {
    %c0_i32 = arith.constant 0 : i32
    %c0_i32_0 = arith.constant 0 : i32
    %c0_i32_1 = arith.constant 0 : i32
    %c0_i32_2 = arith.constant 0 : i32
    return %c0_i32, %c0_i32_0, %c0_i32_1 : i32, i32, i32
  }
  func.func @transform_4(%arg0: i32) -> (i32, i32) {
    %c0_i32 = arith.constant 0 : i32
    %c0_i32_0 = arith.constant 0 : i32
    %c0_i32_1 = arith.constant 0 : i32
    return %c0_i32, %c0_i32_0 : i32, i32
  }
  func.func @transform_5(%arg0: i32) -> (i32, i32) {
    %c0_i32 = arith.constant 0 : i32
    %c0_i32_0 = arith.constant 0 : i32
    %c0_i32_1 = arith.constant 0 : i32
    return %c0_i32, %c0_i32_0 : i32, i32
  }
  func.func @transform_6(%arg0: i32) -> (i32, i32) {
    %c0_i32 = arith.constant 0 : i32
    %c0_i32_0 = arith.constant 0 : i32
    %c0_i32_1 = arith.constant 0 : i32
    return %c0_i32, %c0_i32_0 : i32, i32
  }
  func.func @transform_7(%arg0: i32) -> (i32, i32) {
    %c0_i32 = arith.constant 0 : i32
    %c0_i32_0 = arith.constant 0 : i32
    %c0_i32_1 = arith.constant 0 : i32
    return %c0_i32, %c0_i32_0 : i32, i32
  }
  func.func @transform_8(%arg0: i32) -> (i32, i32) {
    %c0_i32 = arith.constant 0 : i32
    %c0_i32_0 = arith.constant 0 : i32
    %c0_i32_1 = arith.constant 0 : i32
    return %c0_i32, %c0_i32_0 : i32, i32
  }
  func.func @transform_9(%arg0: i32) -> (i32, i32) {
    %c0_i32 = arith.constant 0 : i32
    %c0_i32_0 = arith.constant 0 : i32
    return %arg0, %c0_i32 : i32, i32
  }
}

module attributes {stable_mosaic.version = 11 : i64} {
  func.func @mlp_gnn_kernel(%arg0: i32, %arg1: memref<112x16xf32, #tpu.memory_space<vmem>>, %arg2: memref<16x128xbf16, #tpu.memory_space<vmem>>, %arg3: memref<1x128xf32, #tpu.memory_space<vmem>>, %arg4: memref<2x128x128xbf16, #tpu.memory_space<vmem>>, %arg5: memref<2x128xf32, #tpu.memory_space<vmem>>, %arg6: memref<2x128xf32, #tpu.memory_space<vmem>>, %arg7: memref<2x128xf32, #tpu.memory_space<vmem>>, %arg8: memref<256x128xbf16, #tpu.memory_space<vmem>>, %arg9: memref<1x128xf32, #tpu.memory_space<vmem>>, %arg10: memref<112x128xf32, #tpu.memory_space<vmem>>) attributes {dimension_semantics = [#tpu.dimension_semantics<parallel>], iteration_bounds = array<i64: 2>, scalar_prefetch = 0 : i64, scratch_operands = 0 : i64, tpu.core_type = #tpu.core_type<tc>, window_params = [{transform_indices = @transform_0, window_bounds = array<i64: 112, 16>}, {pipeline_mode = #tpu.pipeline_mode<synchronous>, transform_indices = @transform_1, window_bounds = array<i64: 16, 128>}, {pipeline_mode = #tpu.pipeline_mode<synchronous>, transform_indices = @transform_2, window_bounds = array<i64: 1, 128>}, {pipeline_mode = #tpu.pipeline_mode<synchronous>, transform_indices = @transform_3, window_bounds = array<i64: 2, 128, 128>}, {pipeline_mode = #tpu.pipeline_mode<synchronous>, transform_indices = @transform_4, window_bounds = array<i64: 2, 128>}, {pipeline_mode = #tpu.pipeline_mode<synchronous>, transform_indices = @transform_5, window_bounds = array<i64: 2, 128>}, {pipeline_mode = #tpu.pipeline_mode<synchronous>, transform_indices = @transform_6, window_bounds = array<i64: 2, 128>}, {pipeline_mode = #tpu.pipeline_mode<synchronous>, transform_indices = @transform_7, window_bounds = array<i64: 256, 128>}, {pipeline_mode = #tpu.pipeline_mode<synchronous>, transform_indices = @transform_8, window_bounds = array<i64: 1, 128>}, {transform_indices = @transform_9, window_bounds = array<i64: 112, 128>}]} {
    %c0 = arith.constant 0 : index
    %c0_0 = arith.constant 0 : index
    %0 = vector.load %arg1[%c0, %c0_0] : memref<112x16xf32, #tpu.memory_space<vmem>>, vector<112x16xf32>
    %1 = arith.truncf %0 : vector<112x16xf32> to vector<112x16xbf16>
    %c0_1 = arith.constant 0 : index
    %c0_2 = arith.constant 0 : index
    %2 = vector.load %arg2[%c0_1, %c0_2] : memref<16x128xbf16, #tpu.memory_space<vmem>>, vector<16x128xbf16>
    %cst = arith.constant dense<0.000000e+00> : vector<112x128xf32>
    %3 = tpu.matmul %1, %2, %cst {dimension_numbers = #tpu.dot_dimension_numbers<[1], [0], [0], [1], [0, 0, 1, 1], [], []>} : vector<112x16xbf16>, vector<16x128xbf16>, vector<112x128xf32> -> vector<112x128xf32>
    %c0_3 = arith.constant 0 : index
    %c0_4 = arith.constant 0 : index
    %4 = vector.load %arg3[%c0_3, %c0_4] : memref<1x128xf32, #tpu.memory_space<vmem>>, vector<1x128xf32>
    %5 = vector.broadcast %4 : vector<1x128xf32> to vector<112x128xf32>
    %6 = arith.addf %3, %5 : vector<112x128xf32>
    %c0_i32 = arith.constant 0 : i32
    %cst_5 = arith.constant 0.00999999977 : f32
    %7 = vector.broadcast %cst_5 : f32 to vector<112x128xf32>
    %8 = arith.mulf %7, %6 : vector<112x128xf32>
    %9 = arith.maximumf %6, %8 : vector<112x128xf32>
    %10 = arith.truncf %9 : vector<112x128xf32> to vector<112x128xbf16>
    %11 = arith.index_cast %c0_i32 : i32 to index
    %c0_6 = arith.constant 0 : index
    %c0_7 = arith.constant 0 : index
    %12 = vector.load %arg4[%11, %c0_6, %c0_7] : memref<2x128x128xbf16, #tpu.memory_space<vmem>>, vector<1x128x128xbf16>
    %13 = vector.shape_cast %12 : vector<1x128x128xbf16> to vector<128x128xbf16>
    %cst_8 = arith.constant dense<0.000000e+00> : vector<112x128xf32>
    %14 = tpu.matmul %10, %13, %cst_8 {dimension_numbers = #tpu.dot_dimension_numbers<[1], [0], [0], [1], [0, 0, 1, 1], [], []>} : vector<112x128xbf16>, vector<128x128xbf16>, vector<112x128xf32> -> vector<112x128xf32>
    %15 = arith.index_cast %c0_i32 : i32 to index
    %c0_9 = arith.constant 0 : index
    %16 = vector.load %arg5[%15, %c0_9] : memref<2x128xf32, #tpu.memory_space<vmem>>, vector<1x128xf32>
    %17 = vector.broadcast %16 : vector<1x128xf32> to vector<112x128xf32>
    %18 = arith.addf %14, %17 : vector<112x128xf32>
    %c1_i32 = arith.constant 1 : i32
    %cst_10 = arith.constant 0.00999999977 : f32
    %19 = vector.broadcast %cst_10 : f32 to vector<112x128xf32>
    %20 = arith.mulf %19, %18 : vector<112x128xf32>
    %21 = arith.maximumf %18, %20 : vector<112x128xf32>
    %22 = arith.truncf %21 : vector<112x128xf32> to vector<112x128xbf16>
    %23 = arith.index_cast %c1_i32 : i32 to index
    %c0_11 = arith.constant 0 : index
    %c0_12 = arith.constant 0 : index
    %24 = vector.load %arg4[%23, %c0_11, %c0_12] : memref<2x128x128xbf16, #tpu.memory_space<vmem>>, vector<1x128x128xbf16>
    %25 = vector.shape_cast %24 : vector<1x128x128xbf16> to vector<128x128xbf16>
    %cst_13 = arith.constant dense<0.000000e+00> : vector<112x128xf32>
    %26 = tpu.matmul %22, %25, %cst_13 {dimension_numbers = #tpu.dot_dimension_numbers<[1], [0], [0], [1], [0, 0, 1, 1], [], []>} : vector<112x128xbf16>, vector<128x128xbf16>, vector<112x128xf32> -> vector<112x128xf32>
    %27 = arith.index_cast %c1_i32 : i32 to index
    %c0_14 = arith.constant 0 : index
    %28 = vector.load %arg5[%27, %c0_14] : memref<2x128xf32, #tpu.memory_space<vmem>>, vector<1x128xf32>
    %29 = vector.broadcast %28 : vector<1x128xf32> to vector<112x128xf32>
    %30 = arith.addf %26, %29 : vector<112x128xf32>
    %c2_i32 = arith.constant 2 : i32
    %c0_15 = arith.constant 0 : index
    %c0_16 = arith.constant 0 : index
    %31 = vector.load %arg6[%c0_15, %c0_16] : memref<2x128xf32, #tpu.memory_space<vmem>>, vector<1x128xf32>
    %32 = vector.broadcast %31 : vector<1x128xf32> to vector<112x128xf32>
    %33 = arith.mulf %30, %32 : vector<112x128xf32>
    %c0_17 = arith.constant 0 : index
    %c0_18 = arith.constant 0 : index
    %34 = vector.load %arg7[%c0_17, %c0_18] : memref<2x128xf32, #tpu.memory_space<vmem>>, vector<1x128xf32>
    %35 = vector.broadcast %34 : vector<1x128xf32> to vector<112x128xf32>
    %36 = arith.addf %33, %35 : vector<112x128xf32>
    %cst_19 = arith.constant 0.00999999977 : f32
    %37 = vector.broadcast %cst_19 : f32 to vector<112x128xf32>
    %38 = arith.mulf %37, %36 : vector<112x128xf32>
    %39 = arith.maximumf %36, %38 : vector<112x128xf32>
    %c1 = arith.constant 1 : index
    %c0_20 = arith.constant 0 : index
    %40 = vector.load %arg6[%c1, %c0_20] : memref<2x128xf32, #tpu.memory_space<vmem>>, vector<1x128xf32>
    %41 = vector.broadcast %40 : vector<1x128xf32> to vector<112x128xf32>
    %42 = arith.mulf %30, %41 : vector<112x128xf32>
    %c1_21 = arith.constant 1 : index
    %c0_22 = arith.constant 0 : index
    %43 = vector.load %arg7[%c1_21, %c0_22] : memref<2x128xf32, #tpu.memory_space<vmem>>, vector<1x128xf32>
    %44 = vector.broadcast %43 : vector<1x128xf32> to vector<112x128xf32>
    %45 = arith.addf %42, %44 : vector<112x128xf32>
    %cst_23 = arith.constant 0.00999999977 : f32
    %46 = vector.broadcast %cst_23 : f32 to vector<112x128xf32>
    %47 = arith.mulf %46, %45 : vector<112x128xf32>
    %48 = arith.maximumf %45, %47 : vector<112x128xf32>
    %49 = tpu.concatenate %39, %48 in 1 : vector<112x128xf32>, vector<112x128xf32> -> vector<112x256xf32>
    %50 = arith.truncf %49 : vector<112x256xf32> to vector<112x256xbf16>
    %c0_24 = arith.constant 0 : index
    %c0_25 = arith.constant 0 : index
    %51 = vector.load %arg8[%c0_24, %c0_25] : memref<256x128xbf16, #tpu.memory_space<vmem>>, vector<256x128xbf16>
    %cst_26 = arith.constant dense<0.000000e+00> : vector<112x128xf32>
    %52 = tpu.matmul %50, %51, %cst_26 {dimension_numbers = #tpu.dot_dimension_numbers<[1], [0], [0], [1], [0, 0, 1, 1], [], []>} : vector<112x256xbf16>, vector<256x128xbf16>, vector<112x128xf32> -> vector<112x128xf32>
    %c0_27 = arith.constant 0 : index
    %c0_28 = arith.constant 0 : index
    %53 = vector.load %arg9[%c0_27, %c0_28] : memref<1x128xf32, #tpu.memory_space<vmem>>, vector<1x128xf32>
    %54 = vector.broadcast %53 : vector<1x128xf32> to vector<112x128xf32>
    %55 = arith.addf %52, %54 : vector<112x128xf32>
    %c0_29 = arith.constant 0 : index
    %c0_30 = arith.constant 0 : index
    %56 = vector.load %arg10[%c0_29, %c0_30] : memref<112x128xf32, #tpu.memory_space<vmem>>, vector<112x128xf32>
    tpu.vector_store %arg10[%c0_29, %c0_30], %55 {strides = array<i32>} : memref<112x128xf32, #tpu.memory_space<vmem>>, vector<112x128xf32>,
    return
  }
  func.func @transform_0(%arg0: i32) -> (i32, i32) {
    %c0_i32 = arith.constant 0 : i32
    %c0_i32_0 = arith.constant 0 : i32
    return %arg0, %c0_i32 : i32, i32
  }
  func.func @transform_1(%arg0: i32) -> (i32, i32) {
    %c0_i32 = arith.constant 0 : i32
    %c0_i32_0 = arith.constant 0 : i32
    %c0_i32_1 = arith.constant 0 : i32
    return %c0_i32, %c0_i32_0 : i32, i32
  }
  func.func @transform_2(%arg0: i32) -> (i32, i32) {
    %c0_i32 = arith.constant 0 : i32
    %c0_i32_0 = arith.constant 0 : i32
    %c0_i32_1 = arith.constant 0 : i32
    return %c0_i32, %c0_i32_0 : i32, i32
  }
  func.func @transform_3(%arg0: i32) -> (i32, i32, i32) {
    %c0_i32 = arith.constant 0 : i32
    %c0_i32_0 = arith.constant 0 : i32
    %c0_i32_1 = arith.constant 0 : i32
    %c0_i32_2 = arith.constant 0 : i32
    return %c0_i32, %c0_i32_0, %c0_i32_1 : i32, i32, i32
  }
  func.func @transform_4(%arg0: i32) -> (i32, i32) {
    %c0_i32 = arith.constant 0 : i32
    %c0_i32_0 = arith.constant 0 : i32
    %c0_i32_1 = arith.constant 0 : i32
    return %c0_i32, %c0_i32_0 : i32, i32
  }
  func.func @transform_5(%arg0: i32) -> (i32, i32) {
    %c0_i32 = arith.constant 0 : i32
    %c0_i32_0 = arith.constant 0 : i32
    %c0_i32_1 = arith.constant 0 : i32
    return %c0_i32, %c0_i32_0 : i32, i32
  }
  func.func @transform_6(%arg0: i32) -> (i32, i32) {
    %c0_i32 = arith.constant 0 : i32
    %c0_i32_0 = arith.constant 0 : i32
    %c0_i32_1 = arith.constant 0 : i32
    return %c0_i32, %c0_i32_0 : i32, i32
  }
  func.func @transform_7(%arg0: i32) -> (i32, i32) {
    %c0_i32 = arith.constant 0 : i32
    %c0_i32_0 = arith.constant 0 : i32
    %c0_i32_1 = arith.constant 0 : i32
    return %c0_i32, %c0_i32_0 : i32, i32
  }
  func.func @transform_8(%arg0: i32) -> (i32, i32) {
    %c0_i32 = arith.constant 0 : i32
    %c0_i32_0 = arith.constant 0 : i32
    %c0_i32_1 = arith.constant 0 : i32
    return %c0_i32, %c0_i32_0 : i32, i32
  }
  func.func @transform_9(%arg0: i32) -> (i32, i32) {
    %c0_i32 = arith.constant 0 : i32
    %c0_i32_0 = arith.constant 0 : i32
    return %arg0, %c0_i32 : i32, i32
  }
}

</mosaic_0001>

<bundles_post_ra>
// kernel: tpu_custom_call.1
= control target key start
LH: loop header
LB: loop body
LE: loop exit
PB: predicated region body
PF: predicated region fallthrough
CT: control target
= control target key end

     0   :  { %s2161_s0 = inlined_call_operand.vmem [shape: f32[224,16], index: 0, kind: input, shape index: {}]   ;;  %s2162_s1 = inlined_call_operand.hbm [shape: bf16[16,128], index: 1, kind: input, shape index: {}]   ;;  %s2163_s2 = inlined_call_operand.hbm [shape: f32[1,128], index: 2, kind: input, shape index: {}]   ;;  %s2164_s3 = inlined_call_operand.vmem [shape: bf16[2,128,128], index: 3, kind: input, shape index: {}]   ;;  %s2165_s4 = inlined_call_operand.vmem [shape: f32[2,128], index: 4, kind: input, shape index: {}]   ;;  %s2166_s5 = inlined_call_operand.hbm [shape: f32[2,128], index: 5, kind: input, shape index: {}]   ;;  %s2167_s6 = inlined_call_operand.vmem [shape: f32[2,128], index: 6, kind: input, shape index: {}]   ;;  %s2168_s7 = inlined_call_operand.vmem [shape: bf16[256,128], index: 7, kind: input, shape index: {}]   ;;  %s2169_s8 = inlined_call_operand.vmem [shape: f32[1,128], index: 8, kind: input, shape index: {}]   ;;  %s2170_s9 = inlined_call_operand.hbm [shape: f32[224,128], index: 9, kind: output, shape index: {}]  }
   0x1   :  { %2171 = sst [smem:[#allocation12_spill]] %s2162_s1 }
   0x2   :  { %2172 = sst [smem:[#allocation13_spill]] %s2163_s2 }
   0x3   :  { %14 = vsyncpa [#allocation3], 0 }
   0x4   :  { %15 = vsyncpa [#allocation6], 0 }
   0x5   :  { %16 = vsyncpa [#allocation4], 0 }
   0x6   :  { %18 = vsyncpa [#allocation4 + $0x1], 0  ;;  %s1756_s30 = smov 0   ;;  %s1758_s10 = smov 0  }
   0x7   :  { %s1760_s11 = smov 0   ;;  %s1762_s12 = smov 0  }
   0x8 LB: > { %s1777_s13 = sadd.s32 4294967295, %s1697_s12   ;;  %s1248_s14 = sadd.s32 4294967294, %s1697_s12   ;;  %s1697_s12 = sphi %s1762_s12, %s2182_s12   ;;  %s1693_s11 = sphi %s1760_s11, %s2181_s11   ;;  %s1689_s10 = sphi %s1758_s10, %s2180_s10   ;;  %s1685_s30 = sphi %s1756_s30, %s2179_s30  }
   0x9   : > { %s1781_s15 = sadd.s32 1, %s1697_s12   ;;  %s225_s16 = sadd.s32 1, %s1693_s11 }
   0xa   : > { %s222_s17 = ssub.s32 %s1697_s12, %s1781_s15  ;;  %p235_p0 = scmp.ne.s32.totalorder %s1693_s11, %s1689_s10 }
   0xb   : > { %p223_p1 = scmp.eq.s32.totalorder %s222_s17, 0  ;;  %p236_p2 = scmp.eq.s32.totalorder %s1777_s13, 1 }
   0xc   : > { %p241_p3 = scmp.ne.s32.totalorder %s1689_s10, %s1685_s30  ;;  %p242_p4 = scmp.eq.s32.totalorder %s1248_s14, 1 }
   0xd   : > { %s1792_s18 = scalar_select %p223_p1, %s1693_s11, %s225_s16  }
   0xe   : > { %p1794_p5 = por %p236_p2, %p235_p0  ;;  %p1798_p6 = por %p242_p4, %p241_p3 }
   0xf   : > { %p1249_p7 = scmp.ge.s32.totalorder %s1697_s12, 1  ;;  %p249_p8 = scmp.lt.s32.totalorder %s1697_s12, 3 }
  0x10   : > { %p1483_p9 = scmp.eq.s32.totalorder %s1777_s13, 0  ;;  %s2176_s2 = sld [smem:[#allocation13_spill]] }
  0x11   : > { %p1805_p10 = pnand %p1249_p7, %p249_p8  ;;  %s1699_s25 = smov [#allocation5]  }
  0x12   : > { %s277_s26 = sshll.u32 %s1699_s25, 4  ;;  %s2177_s1 = sld [smem:[#allocation12_spill]]  ;;  %s278_s26 = int_to_ptr.vmem [resolvable:$true] %s277_s26 }
  0x13   : > { %p1469_p11 = pneg %p1805_p10  ;;  %s1700_s16 = smov [#allocation2]  }
  0x14   : > { %s262_s17 = sshll.u32 %s1700_s16, 4  ;;  %s1701_s22 = smov 64   ;;  %s263_s17 = int_to_ptr.vmem [resolvable:$true] %s262_s17 }
  0x15   : > { %p1819_p12 = pnand %p1483_p9, %p1469_p11  ;;  %s1702_s23 = smov 4  }
  0x16   : > { %s275_s24 = sshll.u32 %s2176_s2, 4  ;;  %s293_s28 = sshll.u32 %s2166_s5, 4  ;;  %s276_s24 = int_to_ptr.hbm [resolvable:$true] %s275_s24  ;;  %s294_s28 = int_to_ptr.hbm [resolvable:$true] %s293_s28 }
  0x17   : > { %1475 = dma.hbm_to_vmem [thread:$0]  (!%p1819_p12), %s276_s24, 16, %s278_s26, [#allocation6]  }
  0x18   : > { %s260_s29 = sshll.u32 %s2177_s1, 4  ;;  %s1703_s1 = smov [#allocation7]   ;;  %s261_s29 = int_to_ptr.hbm [resolvable:$true] %s260_s29 }
  0x19   : > { %1472 = dma.hbm_to_vmem [thread:$0]  (!%p1819_p12), %s261_s29, 128, %s263_s17, [#allocation3], %s1701_s22, %s1701_s22, %s1702_s23  }
  0x1a   : > { %s295_s2 = sshll.u32 %s1703_s1, 4  ;;  %326 = sbr.rel (%p1805_p10) target bundleno = 724 (0x2d4), region = 56  ;;  %s296_s2 = int_to_ptr.vmem [resolvable:$true] %s295_s2 }
  0x1b   : > { %1478 = dma.hbm_to_vmem [thread:$0]  (!%p1819_p12), %s294_s28, 32, %s296_s2, [#allocation6]  }
  0x1f   : > { %1672 = dma.done.wait (%p1483_p9), [#allocation3], 128  }
  0x20   : > { %1674 = vsyncadd (%p1483_p9), [#allocation3], 4294967168 }
  0x21   : > { %1676 = dma.done.wait (%p1483_p9), [#allocation6], 48  }
  0x22   : > { %1678 = vsyncadd (%p1483_p9), [#allocation6], 4294967248  ;;  %s373_s1 = smul.u32 14, %s1777_s13  ;;  %v1417_v0 = vld [vmem:[#allocation2] sm:$0xff]  ;;  %v1425_v1 = vld [vmem:[%s2164_s3 + $0x38] sm:$0xff]  ;;  %vm414_vm0 = vcmask 130048  }
  0x23   : > { %443 = vmatpush.bf16.msra.mxu0 %v1417_v0  ;;  %1451 = vmatpush.bf16.msra.mxu1 %v1417_v0  ;;  %v1424_v10 = vld [vmem:[%s2164_s3 + $0x30] sm:$0xff]  ;;  %v1423_v15 = vld [vmem:[%s2164_s3 + $0x28] sm:$0xff]  ;;  %v1422_v16 = vld [vmem:[%s2164_s3 + $0x20] sm:$0xff]  ;;  %s370_s16 = sand.u32 1, %s1689_s10   ;;  %s1450_s27 = smul.u32 112, %s1777_s13 }
  0x24   : > { %p374_p13 = scmp.lt.s32.totalorder %s373_s1, 27  ;;  %1452 = vmatpush.bf16.msra.mxu2 %v1417_v0  ;;  %1453 = vmatpush.bf16.msra.mxu3 %v1417_v0  ;;  %v1421_v26 = vld [vmem:[%s2164_s3 + $0x18] sm:$0xff]  ;;  %v1420_v27 = vld [vmem:[%s2164_s3 + $0x10] sm:$0xff]  ;;  %v1419_v28 = vld [vmem:[%s2164_s3 + $0x8] sm:$0xff]  ;;  %s1454_s23 = smul.u32 112, %s370_s16 }
  0x25   : > { %v1418_v29 = vld [vmem:[%s2164_s3] sm:$0xff]  ;;  %v1893_v31 = vld [vmem:[#allocation5] ss:$0 sm:$0xff]  ;;  %s1140_s13 = scalar_lea.sflag [#allocation4], %s370_s16  ;;  %s1647_s22 = scalar_lea.hbm %s2170_s9, 224 }
  0x26   : > { %s2184_s1 = smov (!%p374_p13, %s373_s1), 27  ;;  %s2098_s25 = scalar_lea.vmem [#allocation8], %s1454_s23 }
  0x27   : > { %s1258_s2 = sshll.u32 %s2184_s1, 3  ;;  %581 = vmatpush.bf16.msrb.mxu1 %v1425_v1  ;;  %s1152_s21 = sshll.u32 %s2098_s25, 4  ;;  %s1153_s21 = int_to_ptr.vmem [resolvable:$true] %s1152_s21 }
  0x28   : > { %s1846_s26 = scalar_lea.vmem %s2161_s0, %s1258_s2  ;;  %s1151_s2 = scalar_lea.hbm %s2170_s9, %s1450_s27 }
  0x29   : > { %v381_v2 = vld [vmem:[%s1846_s26] sm:$0xff]  ;;  %v382_v3 = vld [vmem:[%s1846_s26 + $0x8] sm:$0xff]  ;;  %v383_v17 = vld [vmem:[%s1846_s26 + $0x10] sm:$0xff]  ;;  %s1154_s24 = sshll.u32 %s1151_s2, 4  ;;  %s1155_s24 = int_to_ptr.hbm [resolvable:$true] %s1154_s24 }
  0x2a   : > { %v395_v4 = vpack.c.bf16 %v382_v3, %v381_v2  ;;  %v385_v5 = vld [vmem:[%s1846_s26 + $0x20] sm:$0xff]  ;;  %v386_v6 = vld [vmem:[%s1846_s26 + $0x28] sm:$0xff]  ;;  %v384_v18 = vld [vmem:[%s1846_s26 + $0x18] sm:$0xff] }
  0x2b   : > { %v397_v7 = vpack.c.bf16 %v386_v6, %v385_v5  ;;  %v389_v8 = vld [vmem:[%s1846_s26 + $0x40] sm:$0xff]  ;;  %v390_v9 = vld [vmem:[%s1846_s26 + $0x48] sm:$0xff]  ;;  %582 = vmatpush.bf16.msrb.mxu1 %v1424_v10  ;;  %v387_v19 = vld [vmem:[%s1846_s26 + $0x30] sm:$0xff]  ;;  %v396_v23 = vpack.c.bf16 %v384_v18, %v383_v17 }
  0x2c   : > { %1263 = vmatmul.msk.bf16.vlgmr.msra.gmra.mxu0 %vm414_vm0, %v395_v4  ;;  %v399_v11 = vpack.c.bf16 %v390_v9, %v389_v8  ;;  %v393_v12 = vld [vmem:[%s1846_s26 + $0x60] sm:$0xff]  ;;  %v394_v13 = vld [vmem:[%s1846_s26 + $0x68] sm:$0xff]  ;;  %v388_v20 = vld [vmem:[%s1846_s26 + $0x38] sm:$0xff] }
  0x2d   : > { %1265 = vmatmul.msk.bf16.vlgmr.msra.gmra.mxu1 %vm414_vm0, %v397_v7  ;;  %v401_v14 = vpack.c.bf16 %v394_v13, %v393_v12  ;;  %v391_v21 = vld [vmem:[%s1846_s26 + $0x50] sm:$0xff]  ;;  %v392_v22 = vld [vmem:[%s1846_s26 + $0x58] sm:$0xff]  ;;  %v398_v24 = vpack.c.bf16 %v388_v20, %v387_v19  ;;  %s1641_s26 = sshra.s32 %s1155_s24, 4  ;;  %s1642_s26 = int_to_ptr.hbm [resolvable:$true] %s1641_s26 }
  0x2e   : > { %1267 = vmatmul.msk.bf16.vlgmr.msra.gmra.mxu2 %vm414_vm0, %v399_v11  ;;  %v400_v25 = vpack.c.bf16 %v392_v22, %v391_v21  ;;  %v1432_v17 = vld [vmem:[%s2164_s3 + $0x70] sm:$0xff]  ;;  %v1431_v21 = vld [vmem:[%s2164_s3 + $0x68] sm:$0xff]  ;;  %s1643_s29 = scalar_lea.hbm %s1642_s26, 112  ;;  %p1648_p3 = scmp.lt.s32.totalorder %s1642_s26, %s2170_s9 }
  0x2f   : > { %1269 = vmatmul.msk.bf16.vlgmr.msra.gmra.mxu3 %vm414_vm0, %v401_v14  ;;  %583 = vmatpush.bf16.msrb.mxu1 %v1423_v15  ;;  %v1433_v14 = vld [vmem:[%s2164_s3 + $0x78] sm:$0xff]  ;;  %p1644_p0 = scmp.ne.s32.totalorder %s1642_s26, %s1643_s29  ;;  %p1649_p4 = scmp.lt.s32.totalorder %s1647_s22, %s1643_s29 }
  0x30   : > { %727 = vmatpush.bf16.msrb.mxu2 %v1433_v14 }
  0x31   : > { %p1645_p1 = pnand %p1644_p0, %p1794_p5  ;;  %p1650_p7 = por %p1649_p4, %p1648_p3 }
  0x33   : > { %584 = vmatpush.bf16.msrb.mxu1 %v1422_v16  ;;  %p1646_p2 = pneg %p1645_p1 }
  0x34   : > { %728 = vmatpush.bf16.msrb.mxu2 %v1432_v17 }
  0x35   : > { %p1651_p8 = pnand %p1650_p7, %p1646_p2 }
  0x37   : > { %585 = vmatpush.bf16.msrb.mxu1 %v1421_v26 }
  0x38   : > { %729 = vmatpush.bf16.msrb.mxu2 %v1431_v21  ;;  %v1441_v21 = vld [vmem:[%s2168_s7 + $0x38] sm:$0xff] }
  0x39   : > { %1037 = vmatpush.bf16.msrb.mxu3 %v1441_v21 }
  0x3b   : > { %586 = vmatpush.bf16.msrb.mxu1 %v1420_v27 }
  0x3c   : > { %1264 = vmatmul.msk.bf16.gmra.mxu0 %vm414_vm0, %v396_v23 }
  0x3d   : > { %1266 = vmatmul.msk.bf16.gmra.mxu1 %vm414_vm0, %v398_v24  ;;  %v1430_v24 = vld [vmem:[%s2164_s3 + $0x60] sm:$0xff] }
  0x3e   : > { %1268 = vmatmul.msk.bf16.gmra.mxu2 %vm414_vm0, %v400_v25 }
  0x3f   : > { %587 = vmatpush.bf16.msrb.mxu1 %v1419_v28  ;;  %730 = vmatpush.bf16.msrb.mxu2 %v1430_v24  ;;  %v1448_v24 = vld [vmem:[%s2168_s7 + $0x70] sm:$0xff] }
  0x43   : > { %588 = vmatpush.bf16.msrb.mxu1 %v1418_v29 }
  0xa9   : > { %v445_v30 = vpop.f32.mrf.mxu0 }
  0xaa   : > { %v446_v32 = vadd.f32 %v1893_v31, %v445_v30  ;;  %v455_v41 = vpop.f32.mrf.mxu1 }
  0xab   : > { %v456_v51 = vadd.f32 %v1893_v31, %v455_v41 }
  0xac   : > { %v480_v34 = vmul.f32 0.01, %v446_v32 }
  0xad   : > { %v484_v54 = vmul.f32 0.01, %v456_v51 }
  0xae   : > { %v494_v37 = vmax.f32 %v446_v32, %v480_v34  ;;  %v1429_v34 = vld [vmem:[%s2164_s3 + $0x58] sm:$0xff] }
  0xaf   : > { %v498_v56 = vmax.f32 %v456_v51, %v484_v54  ;;  %731 = vmatpush.bf16.msrb.mxu2 %v1429_v34 }
  0xb1   : > { %v447_v33 = vpop.f32.mrf.mxu0  ;;  %v465_v60 = vpop.f32.mrf.mxu2 }
  0xb2   : > { %v448_v35 = vadd.f32 %v1893_v31, %v447_v33  ;;  %v457_v47 = vpop.f32.mrf.mxu1  ;;  %v466_v5 = vadd.f32 %v1893_v31, %v465_v60  ;;  %v475_v18 = vpop.f32.mrf.mxu3 }
  0xb3   : > { %v458_v52 = vadd.f32 %v1893_v31, %v457_v47  ;;  %v476_v27 = vadd.f32 %v1893_v31, %v475_v18 }
  0xb4   : > { %v481_v36 = vmul.f32 0.01, %v448_v35  ;;  %v488_v8 = vmul.f32 0.01, %v466_v5 }
  0xb5   : > { %v485_v55 = vmul.f32 0.01, %v458_v52  ;;  %v492_v29 = vmul.f32 0.01, %v476_v27 }
  0xb6   : > { %v495_v38 = vmax.f32 %v448_v35, %v481_v36  ;;  %v502_v10 = vmax.f32 %v466_v5, %v488_v8  ;;  %v1428_v36 = vld [vmem:[%s2164_s3 + $0x50] sm:$0xff] }
  0xb7   : > { %v499_v57 = vmax.f32 %v458_v52, %v485_v55  ;;  %v506_v32 = vmax.f32 %v476_v27, %v492_v29  ;;  %732 = vmatpush.bf16.msrb.mxu2 %v1428_v36  ;;  %v1447_v27 = vld [vmem:[%s2168_s7 + $0x68] sm:$0xff] }
  0xb8   : > { %v508_v39 = vpack.c.bf16 %v495_v38, %v494_v37  ;;  %v1426_v37 = vld [vmem:[%s2164_s3 + $0x40] sm:$0xff] }
  0xb9   : > { %v450_v40 = vpop.f32.mrf.mxu0  ;;  %v510_v58 = vpack.c.bf16 %v499_v57, %v498_v56  ;;  %v467_v3 = vpop.f32.mrf.mxu2 }
  0xba   : > { %589 = vmatmul.bf16.vlgmr.msrb.gmra.mxu1 %v508_v39  ;;  %v451_v42 = vadd.f32 %v1893_v31, %v450_v40  ;;  %v460_v53 = vpop.f32.mrf.mxu1  ;;  %v468_v6 = vadd.f32 %v1893_v31, %v467_v3  ;;  %v477_v26 = vpop.f32.mrf.mxu3  ;;  %v1936_v39 = vld [vmem:[%s2165_s4] ss:$0 sm:$0xff] }
  0xbb   : > { %v461_v61 = vadd.f32 %v1893_v31, %v460_v53  ;;  %v478_v28 = vadd.f32 %v1893_v31, %v477_v26  ;;  %v1439_v26 = vld [vmem:[%s2168_s7 + $0x28] sm:$0xff] }
  0xbc   : > { %v482_v44 = vmul.f32 0.01, %v451_v42  ;;  %v489_v9 = vmul.f32 0.01, %v468_v6 }
  0xbd   : > { %v486_v63 = vmul.f32 0.01, %v461_v61  ;;  %v493_v30 = vmul.f32 0.01, %v478_v28 }
  0xbe   : > { %v496_v48 = vmax.f32 %v451_v42, %v482_v44  ;;  %v503_v11 = vmax.f32 %v468_v6, %v489_v9 }
  0xbf   : > { %v500_v1 = vmax.f32 %v461_v61, %v486_v63  ;;  %v507_v33 = vmax.f32 %v478_v28, %v493_v30 }
  0xc0   : > { %v512_v12 = vpack.c.bf16 %v503_v11, %v502_v10 }
  0xc1   : > { %v452_v43 = vpop.f32.mrf.mxu0  ;;  %v470_v7 = vpop.f32.mrf.mxu2  ;;  %v514_v35 = vpack.c.bf16 %v507_v33, %v506_v32 }
  0xc2   : > { %v453_v45 = vadd.f32 %v1893_v31, %v452_v43  ;;  %v462_v59 = vpop.f32.mrf.mxu1  ;;  %v471_v15 = vadd.f32 %v1893_v31, %v470_v7 }
  0xc3   : > { %v463_v62 = vadd.f32 %v1893_v31, %v462_v59 }
  0xc4   : > { %v483_v46 = vmul.f32 0.01, %v453_v45  ;;  %v490_v19 = vmul.f32 0.01, %v471_v15 }
  0xc5   : > { %v487_v0 = vmul.f32 0.01, %v463_v62 }
  0xc6   : > { %v497_v49 = vmax.f32 %v453_v45, %v483_v46  ;;  %v504_v22 = vmax.f32 %v471_v15, %v490_v19 }
  0xc7   : > { %v501_v2 = vmax.f32 %v463_v62, %v487_v0 }
  0xc8   : > { %v509_v50 = vpack.c.bf16 %v497_v49, %v496_v48 }
  0xc9   : > { %v511_v4 = vpack.c.bf16 %v501_v2, %v500_v1  ;;  %v472_v13 = vpop.f32.mrf.mxu2 }
  0xca   : > { %594 = vmatmul.bf16.gmra.mxu1 %v509_v50  ;;  %v473_v16 = vadd.f32 %v1893_v31, %v472_v13  ;;  %v1427_v31 = vld [vmem:[%s2164_s3 + $0x48] sm:$0xff] }
  0xcb   : > { %733 = vmatpush.bf16.msrb.mxu2 %v1427_v31 }
  0xcc   : > { %v491_v20 = vmul.f32 0.01, %v473_v16 }
  0xce   : > { %v505_v23 = vmax.f32 %v473_v16, %v491_v20 }
  0xcf   : > { %734 = vmatpush.bf16.msrb.mxu2 %v1426_v37 }
  0xd0   : > { %v513_v25 = vpack.c.bf16 %v505_v23, %v504_v22  ;;  %v1449_v22 = vld [vmem:[%s2168_s7 + $0x78] sm:$0xff]  ;;  %v1440_v23 = vld [vmem:[%s2168_s7 + $0x30] sm:$0xff] }
  0xd1   : > { %1081 = vmatpush.bf16.msrb.mxu0 %v1449_v22  ;;  %1038 = vmatpush.bf16.msrb.mxu3 %v1440_v23 }
  0xd5   : > { %1082 = vmatpush.bf16.msrb.mxu0 %v1448_v24  ;;  %1039 = vmatpush.bf16.msrb.mxu3 %v1439_v26 }
  0xd9   : > { %1083 = vmatpush.bf16.msrb.mxu0 %v1447_v27 }
  0xda   : > { %599 = vmatmul.bf16.gmra.mxu1 %v510_v58 }
  0xea   : > { %604 = vmatmul.bf16.gmra.mxu1 %v511_v4 }
  0xfa   : > { %609 = vmatmul.bf16.gmra.mxu1 %v512_v12 }
 0x10a   : > { %614 = vmatmul.bf16.gmra.mxu1 %v513_v25 }
 0x11a   : > { %619 = vmatmul.bf16.gmra.mxu1 %v514_v35 }
 0x137   : > { %v590_v38 = vpop.f32.mrf.mxu1 }
 0x138   : > { %v591_v40 = vadd.f32 %v1936_v39, %v590_v38 }
 0x13a   : > { %v625_v42 = vmul.f32 0.01, %v591_v40 }
 0x13c   : > { %v639_v45 = vmax.f32 %v591_v40, %v625_v42 }
 0x13f   : > { %v592_v41 = vpop.f32.mrf.mxu1 }
 0x140   : > { %v593_v43 = vadd.f32 %v1936_v39, %v592_v41 }
 0x142   : > { %v626_v44 = vmul.f32 0.01, %v593_v43 }
 0x144   : > { %v640_v46 = vmax.f32 %v593_v43, %v626_v44 }
 0x146   : > { %v653_v47 = vpack.c.bf16 %v640_v46, %v639_v45  ;;  %v1438_v45 = vld [vmem:[%s2168_s7 + $0x20] sm:$0xff] }
 0x147   : > { %v595_v48 = vpop.f32.mrf.mxu1  ;;  %v1446_v46 = vld [vmem:[%s2168_s7 + $0x60] sm:$0xff]  ;;  %1040 = vmatpush.bf16.msrb.mxu3 %v1438_v45 }
 0x148   : > { %735 = vmatmul.bf16.vlgmr.msrb.gmra.mxu2 %v653_v47  ;;  %v596_v49 = vadd.f32 %v1936_v39, %v595_v48  ;;  %1084 = vmatpush.bf16.msrb.mxu0 %v1446_v46  ;;  %v1437_v47 = vld [vmem:[%s2168_s7 + $0x18] sm:$0xff]  ;;  %v1436_v48 = vld [vmem:[%s2168_s7 + $0x10] sm:$0xff] }
 0x14a   : > { %v627_v51 = vmul.f32 0.01, %v596_v49 }
 0x14b   : > { %1041 = vmatpush.bf16.msrb.mxu3 %v1437_v47 }
 0x14c   : > { %v641_v54 = vmax.f32 %v596_v49, %v627_v51  ;;  %v1444_v49 = vld [vmem:[%s2168_s7 + $0x50] sm:$0xff]  ;;  %v1443_v51 = vld [vmem:[%s2168_s7 + $0x48] sm:$0xff] }
 0x14f   : > { %v597_v50 = vpop.f32.mrf.mxu1  ;;  %1042 = vmatpush.bf16.msrb.mxu3 %v1436_v48 }
 0x150   : > { %v598_v52 = vadd.f32 %v1936_v39, %v597_v50  ;;  %v1435_v50 = vld [vmem:[%s2168_s7 + $0x8] sm:$0xff] }
 0x152   : > { %v628_v53 = vmul.f32 0.01, %v598_v52 }
 0x153   : > { %1043 = vmatpush.bf16.msrb.mxu3 %v1435_v50 }
 0x154   : > { %v642_v55 = vmax.f32 %v598_v52, %v628_v53  ;;  %v1434_v52 = vld [vmem:[%s2168_s7] sm:$0xff] }
 0x155   : > { %v1442_v53 = vld [vmem:[%s2168_s7 + $0x40] sm:$0xff] }
 0x156   : > { %v654_v56 = vpack.c.bf16 %v642_v55, %v641_v54  ;;  %v2003_v54 = vld [vmem:[%s2165_s4 + $0x1] ss:$0 sm:$0xff] }
 0x157   : > { %v600_v57 = vpop.f32.mrf.mxu1  ;;  %1044 = vmatpush.bf16.msrb.mxu3 %v1434_v52 }
 0x158   : > { %740 = vmatmul.bf16.gmra.mxu2 %v654_v56  ;;  %v601_v58 = vadd.f32 %v1936_v39, %v600_v57  ;;  %v2005_v56 = vld [vmem:[#allocation7] ss:$0 sm:$0xff] }
 0x15a   : > { %v629_v60 = vmul.f32 0.01, %v601_v58 }
 0x15c   : > { %v643_v63 = vmax.f32 %v601_v58, %v629_v60  ;;  %v2008_v58 = vld [vmem:[#allocation7 + $0x1] ss:$0 sm:$0xff]  ;;  %v2014_v60 = vld [vmem:[%s2167_s6] ss:$0 sm:$0xff] }
 0x15f   : > { %v602_v59 = vpop.f32.mrf.mxu1 }
 0x160   : > { %v603_v61 = vadd.f32 %v1936_v39, %v602_v59 }
 0x162   : > { %v630_v62 = vmul.f32 0.01, %v603_v61 }
 0x164   : > { %v644_v0 = vmax.f32 %v603_v61, %v630_v62  ;;  %v2020_v62 = vld [vmem:[%s2167_s6 + $0x1] ss:$0 sm:$0xff] }
 0x166   : > { %v655_v1 = vpack.c.bf16 %v644_v0, %v643_v63 }
 0x167   : > { %v605_v2 = vpop.f32.mrf.mxu1 }
 0x168   : > { %745 = vmatmul.bf16.gmra.mxu2 %v655_v1  ;;  %v606_v3 = vadd.f32 %v1936_v39, %v605_v2 }
 0x16a   : > { %v631_v5 = vmul.f32 0.01, %v606_v3 }
 0x16c   : > { %v645_v8 = vmax.f32 %v606_v3, %v631_v5 }
 0x16f   : > { %v607_v4 = vpop.f32.mrf.mxu1 }
 0x170   : > { %v608_v6 = vadd.f32 %v1936_v39, %v607_v4 }
 0x172   : > { %v632_v7 = vmul.f32 0.01, %v608_v6 }
 0x174   : > { %v646_v9 = vmax.f32 %v608_v6, %v632_v7 }
 0x176   : > { %v656_v10 = vpack.c.bf16 %v646_v9, %v645_v8 }
 0x177   : > { %v610_v11 = vpop.f32.mrf.mxu1 }
 0x178   : > { %750 = vmatmul.bf16.gmra.mxu2 %v656_v10  ;;  %v611_v12 = vadd.f32 %v1936_v39, %v610_v11 }
 0x17a   : > { %v633_v14 = vmul.f32 0.01, %v611_v12 }
 0x17c   : > { %v647_v17 = vmax.f32 %v611_v12, %v633_v14 }
 0x17f   : > { %v612_v13 = vpop.f32.mrf.mxu1 }
 0x180   : > { %v613_v15 = vadd.f32 %v1936_v39, %v612_v13 }
 0x182   : > { %v634_v16 = vmul.f32 0.01, %v613_v15 }
 0x184   : > { %v648_v18 = vmax.f32 %v613_v15, %v634_v16 }
 0x186   : > { %v657_v19 = vpack.c.bf16 %v648_v18, %v647_v17 }
 0x187   : > { %v615_v20 = vpop.f32.mrf.mxu1 }
 0x188   : > { %755 = vmatmul.bf16.gmra.mxu2 %v657_v19  ;;  %v616_v25 = vadd.f32 %v1936_v39, %v615_v20 }
 0x18a   : > { %v635_v29 = vmul.f32 0.01, %v616_v25 }
 0x18c   : > { %v649_v33 = vmax.f32 %v616_v25, %v635_v29 }
 0x18f   : > { %v617_v28 = vpop.f32.mrf.mxu1 }
 0x190   : > { %v618_v30 = vadd.f32 %v1936_v39, %v617_v28 }
 0x192   : > { %v636_v32 = vmul.f32 0.01, %v618_v30 }
 0x194   : > { %v650_v34 = vmax.f32 %v618_v30, %v636_v32 }
 0x196   : > { %v658_v35 = vpack.c.bf16 %v650_v34, %v649_v33 }
 0x197   : > { %v620_v36 = vpop.f32.mrf.mxu1 }
 0x198   : > { %760 = vmatmul.bf16.gmra.mxu2 %v658_v35  ;;  %v621_v31 = vadd.f32 %v1936_v39, %v620_v36 }
 0x19a   : > { %v637_v38 = vmul.f32 0.01, %v621_v31 }
 0x19c   : > { %v651_v42 = vmax.f32 %v621_v31, %v637_v38 }
 0x19f   : > { %v622_v37 = vpop.f32.mrf.mxu1 }
 0x1a0   : > { %v623_v40 = vadd.f32 %v1936_v39, %v622_v37  ;;  %v1445_v39 = vld [vmem:[%s2168_s7 + $0x58] sm:$0xff] }
 0x1a1   : > { %1085 = vmatpush.bf16.msrb.mxu0 %v1445_v39 }
 0x1a2   : > { %v638_v41 = vmul.f32 0.01, %v623_v40 }
 0x1a4   : > { %v652_v43 = vmax.f32 %v623_v40, %v638_v41 }
 0x1a5   : > { %1086 = vmatpush.bf16.msrb.mxu0 %v1444_v49 }
 0x1a6   : > { %v659_v44 = vpack.c.bf16 %v652_v43, %v651_v42 }
 0x1a8   : > { %765 = vmatmul.bf16.gmra.mxu2 %v659_v44 }
 0x1a9   : > { %1087 = vmatpush.bf16.msrb.mxu0 %v1443_v51 }
 0x1ad   : > { %1088 = vmatpush.bf16.msrb.mxu0 %v1442_v53 }
 0x1cb   : > { %v736_v55 = vpop.f32.mrf.mxu2 }
 0x1cc   : > { %v737_v57 = vadd.f32 %v2003_v54, %v736_v55 }
 0x1ce   : > { %v773_v59 = vmul.f32 %v2005_v56, %v737_v57  ;;  %v833_v61 = vmul.f32 %v2008_v58, %v737_v57 }
 0x1d0   : > { %v789_v63 = vadd.f32 %v2014_v60, %v773_v59  ;;  %v849_v1 = vadd.f32 %v2020_v62, %v833_v61 }
 0x1d2   : > { %v803_v5 = vmul.f32 0.01, %v789_v63  ;;  %v863_v6 = vmul.f32 0.01, %v849_v1 }
 0x1d3   : > { %v738_v0 = vpop.f32.mrf.mxu2 }
 0x1d4   : > { %v739_v2 = vadd.f32 %v2003_v54, %v738_v0  ;;  %v817_v12 = vmax.f32 %v789_v63, %v803_v5  ;;  %v877_v15 = vmax.f32 %v849_v1, %v863_v6 }
 0x1d6   : > { %v774_v3 = vmul.f32 %v2005_v56, %v739_v2  ;;  %v834_v4 = vmul.f32 %v2008_v58, %v739_v2 }
 0x1d8   : > { %v790_v7 = vadd.f32 %v2014_v60, %v774_v3  ;;  %v850_v8 = vadd.f32 %v2020_v62, %v834_v4 }
 0x1da   : > { %v804_v9 = vmul.f32 0.01, %v790_v7  ;;  %v864_v10 = vmul.f32 0.01, %v850_v8 }
 0x1db   : > { %v741_v11 = vpop.f32.mrf.mxu2 }
 0x1dc   : > { %v742_v13 = vadd.f32 %v2003_v54, %v741_v11  ;;  %v818_v14 = vmax.f32 %v790_v7, %v804_v9  ;;  %v878_v16 = vmax.f32 %v850_v8, %v864_v10 }
 0x1de   : > { %v891_v17 = vpack.c.bf16 %v818_v14, %v817_v12  ;;  %v892_v18 = vpack.c.bf16 %v878_v16, %v877_v15  ;;  %v775_v19 = vmul.f32 %v2005_v56, %v742_v13  ;;  %v835_v20 = vmul.f32 %v2008_v58, %v742_v13 }
 0x1e0   : > { %1045 = vmatmul.bf16.vlgmr.msrb.gmra.mxu3 %v891_v17  ;;  %1089 = vmatmul.bf16.vlgmr.msrb.gmra.mxu0 %v892_v18  ;;  %v791_v21 = vadd.f32 %v2014_v60, %v775_v19  ;;  %v851_v23 = vadd.f32 %v2020_v62, %v835_v20 }
 0x1e2   : > { %v805_v27 = vmul.f32 0.01, %v791_v21  ;;  %v865_v30 = vmul.f32 0.01, %v851_v23 }
 0x1e3   : > { %v743_v22 = vpop.f32.mrf.mxu2 }
 0x1e4   : > { %v744_v24 = vadd.f32 %v2003_v54, %v743_v22  ;;  %v819_v35 = vmax.f32 %v791_v21, %v805_v27  ;;  %v879_v37 = vmax.f32 %v851_v23, %v865_v30 }
 0x1e6   : > { %v776_v25 = vmul.f32 %v2005_v56, %v744_v24  ;;  %v836_v26 = vmul.f32 %v2008_v58, %v744_v24 }
 0x1e8   : > { %v792_v28 = vadd.f32 %v2014_v60, %v776_v25  ;;  %v852_v29 = vadd.f32 %v2020_v62, %v836_v26 }
 0x1ea   : > { %v806_v32 = vmul.f32 0.01, %v792_v28  ;;  %v866_v33 = vmul.f32 0.01, %v852_v29 }
 0x1eb   : > { %v746_v34 = vpop.f32.mrf.mxu2 }
 0x1ec   : > { %v747_v36 = vadd.f32 %v2003_v54, %v746_v34  ;;  %v820_v31 = vmax.f32 %v792_v28, %v806_v32  ;;  %v880_v38 = vmax.f32 %v852_v29, %v866_v33 }
 0x1ee   : > { %v893_v40 = vpack.c.bf16 %v820_v31, %v819_v35  ;;  %v894_v41 = vpack.c.bf16 %v880_v38, %v879_v37  ;;  %v777_v42 = vmul.f32 %v2005_v56, %v747_v36  ;;  %v837_v43 = vmul.f32 %v2008_v58, %v747_v36 }
 0x1f0   : > { %1050 = vmatmul.bf16.gmra.mxu3 %v893_v40  ;;  %1094 = vmatmul.bf16.gmra.mxu0 %v894_v41  ;;  %v793_v44 = vadd.f32 %v2014_v60, %v777_v42  ;;  %v853_v46 = vadd.f32 %v2020_v62, %v837_v43 }
 0x1f2   : > { %v807_v49 = vmul.f32 0.01, %v793_v44  ;;  %v867_v52 = vmul.f32 0.01, %v853_v46 }
 0x1f3   : > { %v748_v45 = vpop.f32.mrf.mxu2 }
 0x1f4   : > { %v749_v47 = vadd.f32 %v2003_v54, %v748_v45  ;;  %v821_v59 = vmax.f32 %v793_v44, %v807_v49  ;;  %v881_v0 = vmax.f32 %v853_v46, %v867_v52 }
 0x1f6   : > { %v778_v39 = vmul.f32 %v2005_v56, %v749_v47  ;;  %v838_v48 = vmul.f32 %v2008_v58, %v749_v47 }
 0x1f8   : > { %v794_v50 = vadd.f32 %v2014_v60, %v778_v39  ;;  %v854_v51 = vadd.f32 %v2020_v62, %v838_v48 }
 0x1fa   : > { %v808_v53 = vmul.f32 0.01, %v794_v50  ;;  %v868_v55 = vmul.f32 0.01, %v854_v51 }
 0x1fb   : > { %v751_v57 = vpop.f32.mrf.mxu2 }
 0x1fc   : > { %v752_v61 = vadd.f32 %v2003_v54, %v751_v57  ;;  %v822_v63 = vmax.f32 %v794_v50, %v808_v53  ;;  %v882_v1 = vmax.f32 %v854_v51, %v868_v55 }
 0x1fe   : > { %v895_v2 = vpack.c.bf16 %v822_v63, %v821_v59  ;;  %v896_v3 = vpack.c.bf16 %v882_v1, %v881_v0  ;;  %v779_v4 = vmul.f32 %v2005_v56, %v752_v61  ;;  %v839_v5 = vmul.f32 %v2008_v58, %v752_v61 }
 0x200   : > { %1055 = vmatmul.bf16.gmra.mxu3 %v895_v2  ;;  %1099 = vmatmul.bf16.gmra.mxu0 %v896_v3  ;;  %v795_v6 = vadd.f32 %v2014_v60, %v779_v4  ;;  %v855_v8 = vadd.f32 %v2020_v62, %v839_v5 }
 0x202   : > { %v809_v12 = vmul.f32 0.01, %v795_v6  ;;  %v869_v15 = vmul.f32 0.01, %v855_v8 }
 0x203   : > { %v753_v7 = vpop.f32.mrf.mxu2 }
 0x204   : > { %v754_v9 = vadd.f32 %v2003_v54, %v753_v7  ;;  %v823_v19 = vmax.f32 %v795_v6, %v809_v12  ;;  %v883_v22 = vmax.f32 %v855_v8, %v869_v15 }
 0x206   : > { %v780_v10 = vmul.f32 %v2005_v56, %v754_v9  ;;  %v840_v11 = vmul.f32 %v2008_v58, %v754_v9 }
 0x208   : > { %v796_v13 = vadd.f32 %v2014_v60, %v780_v10  ;;  %v856_v14 = vadd.f32 %v2020_v62, %v840_v11 }
 0x20a   : > { %v810_v16 = vmul.f32 0.01, %v796_v13  ;;  %v870_v17 = vmul.f32 0.01, %v856_v14 }
 0x20b   : > { %v756_v18 = vpop.f32.mrf.mxu2 }
 0x20c   : > { %v757_v20 = vadd.f32 %v2003_v54, %v756_v18  ;;  %v824_v21 = vmax.f32 %v796_v13, %v810_v16  ;;  %v884_v23 = vmax.f32 %v856_v14, %v870_v17 }
 0x20e   : > { %v897_v24 = vpack.c.bf16 %v824_v21, %v823_v19  ;;  %v898_v25 = vpack.c.bf16 %v884_v23, %v883_v22  ;;  %v781_v26 = vmul.f32 %v2005_v56, %v757_v20  ;;  %v841_v27 = vmul.f32 %v2008_v58, %v757_v20 }
 0x210   : > { %1060 = vmatmul.bf16.gmra.mxu3 %v897_v24  ;;  %1104 = vmatmul.bf16.gmra.mxu0 %v898_v25  ;;  %v797_v28 = vadd.f32 %v2014_v60, %v781_v26  ;;  %v857_v30 = vadd.f32 %v2020_v62, %v841_v27 }
 0x212   : > { %v811_v35 = vmul.f32 0.01, %v797_v28  ;;  %v871_v37 = vmul.f32 0.01, %v857_v30 }
 0x213   : > { %v758_v29 = vpop.f32.mrf.mxu2 }
 0x214   : > { %v759_v32 = vadd.f32 %v2003_v54, %v758_v29  ;;  %v825_v42 = vmax.f32 %v797_v28, %v811_v35  ;;  %v885_v45 = vmax.f32 %v857_v30, %v871_v37 }
 0x216   : > { %v782_v33 = vmul.f32 %v2005_v56, %v759_v32  ;;  %v842_v34 = vmul.f32 %v2008_v58, %v759_v32 }
 0x218   : > { %v798_v36 = vadd.f32 %v2014_v60, %v782_v33  ;;  %v858_v31 = vadd.f32 %v2020_v62, %v842_v34 }
 0x21a   : > { %v812_v38 = vmul.f32 0.01, %v798_v36  ;;  %v872_v40 = vmul.f32 0.01, %v858_v31 }
 0x21b   : > { %v761_v41 = vpop.f32.mrf.mxu2 }
 0x21c   : > { %v762_v43 = vadd.f32 %v2003_v54, %v761_v41  ;;  %v826_v44 = vmax.f32 %v798_v36, %v812_v38  ;;  %v886_v46 = vmax.f32 %v858_v31, %v872_v40 }
 0x21e   : > { %v899_v47 = vpack.c.bf16 %v826_v44, %v825_v42  ;;  %v900_v39 = vpack.c.bf16 %v886_v46, %v885_v45  ;;  %v783_v48 = vmul.f32 %v2005_v56, %v762_v43  ;;  %v843_v49 = vmul.f32 %v2008_v58, %v762_v43 }
 0x220   : > { %1065 = vmatmul.bf16.gmra.mxu3 %v899_v47  ;;  %1109 = vmatmul.bf16.gmra.mxu0 %v900_v39  ;;  %v799_v50 = vadd.f32 %v2014_v60, %v783_v48  ;;  %v859_v52 = vadd.f32 %v2020_v62, %v843_v49 }
 0x222   : > { %v813_v59 = vmul.f32 0.01, %v799_v50  ;;  %v873_v0 = vmul.f32 0.01, %v859_v52 }
 0x223   : > { %v763_v51 = vpop.f32.mrf.mxu2 }
 0x224   : > { %v764_v53 = vadd.f32 %v2003_v54, %v763_v51  ;;  %v827_v4 = vmax.f32 %v799_v50, %v813_v59  ;;  %v887_v7 = vmax.f32 %v859_v52, %v873_v0 }
 0x226   : > { %v784_v55 = vmul.f32 %v2005_v56, %v764_v53  ;;  %v844_v57 = vmul.f32 %v2008_v58, %v764_v53 }
 0x228   : > { %v800_v61 = vadd.f32 %v2014_v60, %v784_v55  ;;  %v860_v63 = vadd.f32 %v2020_v62, %v844_v57 }
 0x22a   : > { %v814_v1 = vmul.f32 0.01, %v800_v61  ;;  %v874_v2 = vmul.f32 0.01, %v860_v63 }
 0x22b   : > { %v766_v3 = vpop.f32.mrf.mxu2 }
 0x22c   : > { %v767_v5 = vadd.f32 %v2003_v54, %v766_v3  ;;  %v828_v6 = vmax.f32 %v800_v61, %v814_v1  ;;  %v888_v8 = vmax.f32 %v860_v63, %v874_v2 }
 0x22e   : > { %v901_v9 = vpack.c.bf16 %v828_v6, %v827_v4  ;;  %v902_v10 = vpack.c.bf16 %v888_v8, %v887_v7  ;;  %v785_v11 = vmul.f32 %v2005_v56, %v767_v5  ;;  %v845_v12 = vmul.f32 %v2008_v58, %v767_v5 }
 0x230   : > { %1070 = vmatmul.bf16.gmra.mxu3 %v901_v9  ;;  %1114 = vmatmul.bf16.gmra.mxu0 %v902_v10  ;;  %v801_v14 = vadd.f32 %v2014_v60, %v785_v11  ;;  %v861_v15 = vadd.f32 %v2020_v62, %v845_v12 }
 0x232   : > { %v815_v21 = vmul.f32 0.01, %v801_v14  ;;  %v875_v22 = vmul.f32 0.01, %v861_v15 }
 0x233   : > { %v768_v13 = vpop.f32.mrf.mxu2 }
 0x234   : > { %v769_v16 = vadd.f32 %v2003_v54, %v768_v13  ;;  %v829_v25 = vmax.f32 %v801_v14, %v815_v21  ;;  %v889_v27 = vmax.f32 %v861_v15, %v875_v22 }
 0x236   : > { %v786_v17 = vmul.f32 %v2005_v56, %v769_v16  ;;  %v846_v18 = vmul.f32 %v2008_v58, %v769_v16  ;;  %v2093_v58 = vld [vmem:[%s2169_s8] ss:$0 sm:$0xff] }
 0x238   : > { %v802_v19 = vadd.f32 %v2014_v60, %v786_v17  ;;  %v862_v20 = vadd.f32 %v2020_v62, %v846_v18 }
 0x23a   : > { %v816_v23 = vmul.f32 0.01, %v802_v19  ;;  %v876_v24 = vmul.f32 0.01, %v862_v20 }
 0x23c   : > { %v830_v26 = vmax.f32 %v802_v19, %v816_v23  ;;  %v890_v28 = vmax.f32 %v862_v20, %v876_v24 }
 0x23e   : > { %v903_v29 = vpack.c.bf16 %v830_v26, %v829_v25  ;;  %v904_v54 = vpack.c.bf16 %v890_v28, %v889_v27 }
 0x240   : > { %1075 = vmatmul.bf16.gmra.mxu3 %v903_v29  ;;  %1119 = vmatmul.bf16.gmra.mxu0 %v904_v54 }
 0x25d   : > { %v1090_v56 = vpop.f32.mrf.mxu0 }
 0x263   : > { %v1046_v60 = vpop.f32.mrf.mxu3 }
 0x264   : > { %v1047_v62 = vadd.f32 %v2093_v58, %v1046_v60 }
 0x265   : > { %v1092_v30 = vpop.f32.mrf.mxu0 }
 0x266   : > { %v1091_v32 = vadd.f32 %v1090_v56, %v1047_v62 }
 0x268   : > { %1125 = vst [vmem:[%s2098_s25] sm:$0xff] %v1091_v32 }
 0x26b   : > { %v1048_v33 = vpop.f32.mrf.mxu3 }
 0x26c   : > { %v1049_v34 = vadd.f32 %v2093_v58, %v1048_v33 }
 0x26d   : > { %v1095_v35 = vpop.f32.mrf.mxu0 }
 0x26e   : > { %v1093_v36 = vadd.f32 %v1092_v30, %v1049_v34 }
 0x270   : > { %1126 = vst [vmem:[%s2098_s25 + $0x8] sm:$0xff] %v1093_v36 }
 0x273   : > { %v1051_v31 = vpop.f32.mrf.mxu3 }
 0x274   : > { %v1052_v37 = vadd.f32 %v2093_v58, %v1051_v31 }
 0x275   : > { %v1097_v38 = vpop.f32.mrf.mxu0 }
 0x276   : > { %v1096_v40 = vadd.f32 %v1095_v35, %v1052_v37 }
 0x278   : > { %1127 = vst [vmem:[%s2098_s25 + $0x10] sm:$0xff] %v1096_v40 }
 0x27b   : > { %v1053_v41 = vpop.f32.mrf.mxu3 }
 0x27c   : > { %v1054_v42 = vadd.f32 %v2093_v58, %v1053_v41 }
 0x27d   : > { %v1100_v43 = vpop.f32.mrf.mxu0 }
 0x27e   : > { %v1098_v44 = vadd.f32 %v1097_v38, %v1054_v42 }
 0x280   : > { %1128 = vst [vmem:[%s2098_s25 + $0x18] sm:$0xff] %v1098_v44 }
 0x283   : > { %v1056_v45 = vpop.f32.mrf.mxu3 }
 0x284   : > { %v1057_v46 = vadd.f32 %v2093_v58, %v1056_v45 }
 0x285   : > { %v1102_v47 = vpop.f32.mrf.mxu0 }
 0x286   : > { %v1101_v39 = vadd.f32 %v1100_v43, %v1057_v46 }
 0x288   : > { %1129 = vst [vmem:[%s2098_s25 + $0x20] sm:$0xff] %v1101_v39 }
 0x28b   : > { %v1058_v48 = vpop.f32.mrf.mxu3 }
 0x28c   : > { %v1059_v49 = vadd.f32 %v2093_v58, %v1058_v48 }
 0x28d   : > { %v1105_v50 = vpop.f32.mrf.mxu0 }
 0x28e   : > { %v1103_v51 = vadd.f32 %v1102_v47, %v1059_v49 }
 0x290   : > { %1130 = vst [vmem:[%s2098_s25 + $0x28] sm:$0xff] %v1103_v51 }
 0x293   : > { %v1061_v52 = vpop.f32.mrf.mxu3 }
 0x294   : > { %v1062_v53 = vadd.f32 %v2093_v58, %v1061_v52 }
 0x295   : > { %v1107_v55 = vpop.f32.mrf.mxu0 }
 0x296   : > { %v1106_v57 = vadd.f32 %v1105_v50, %v1062_v53 }
 0x298   : > { %1131 = vst [vmem:[%s2098_s25 + $0x30] sm:$0xff] %v1106_v57 }
 0x29b   : > { %v1063_v59 = vpop.f32.mrf.mxu3 }
 0x29c   : > { %v1064_v61 = vadd.f32 %v2093_v58, %v1063_v59 }
 0x29d   : > { %v1110_v63 = vpop.f32.mrf.mxu0 }
 0x29e   : > { %v1108_v0 = vadd.f32 %v1107_v55, %v1064_v61 }
 0x2a0   : > { %1132 = vst [vmem:[%s2098_s25 + $0x38] sm:$0xff] %v1108_v0 }
 0x2a3   : > { %v1066_v1 = vpop.f32.mrf.mxu3 }
 0x2a4   : > { %v1067_v2 = vadd.f32 %v2093_v58, %v1066_v1 }
 0x2a5   : > { %v1112_v3 = vpop.f32.mrf.mxu0 }
 0x2a6   : > { %v1111_v4 = vadd.f32 %v1110_v63, %v1067_v2 }
 0x2a8   : > { %1133 = vst [vmem:[%s2098_s25 + $0x40] sm:$0xff] %v1111_v4 }
 0x2ab   : > { %v1068_v5 = vpop.f32.mrf.mxu3 }
 0x2ac   : > { %v1069_v6 = vadd.f32 %v2093_v58, %v1068_v5 }
 0x2ad   : > { %v1115_v8 = vpop.f32.mrf.mxu0 }
 0x2ae   : > { %v1113_v7 = vadd.f32 %v1112_v3, %v1069_v6 }
 0x2b0   : > { %1134 = vst [vmem:[%s2098_s25 + $0x48] sm:$0xff] %v1113_v7 }
 0x2b3   : > { %v1071_v9 = vpop.f32.mrf.mxu3 }
 0x2b4   : > { %v1072_v10 = vadd.f32 %v2093_v58, %v1071_v9 }
 0x2b5   : > { %v1117_v12 = vpop.f32.mrf.mxu0 }
 0x2b6   : > { %v1116_v11 = vadd.f32 %v1115_v8, %v1072_v10 }
 0x2b8   : > { %1135 = vst [vmem:[%s2098_s25 + $0x50] sm:$0xff] %v1116_v11 }
 0x2bb   : > { %v1073_v13 = vpop.f32.mrf.mxu3 }
 0x2bc   : > { %v1074_v14 = vadd.f32 %v2093_v58, %v1073_v13 }
 0x2bd   : > { %v1120_v16 = vpop.f32.mrf.mxu0 }
 0x2be   : > { %v1118_v15 = vadd.f32 %v1117_v12, %v1074_v14 }
 0x2c0   : > { %1136 = vst [vmem:[%s2098_s25 + $0x58] sm:$0xff] %v1118_v15 }
 0x2c3   : > { %v1076_v17 = vpop.f32.mrf.mxu3 }
 0x2c4   : > { %v1077_v18 = vadd.f32 %v2093_v58, %v1076_v17 }
 0x2c5   : > { %v1122_v22 = vpop.f32.mrf.mxu0 }
 0x2c6   : > { %v1121_v19 = vadd.f32 %v1120_v16, %v1077_v18 }
 0x2c8   : > { %1137 = vst [vmem:[%s2098_s25 + $0x60] sm:$0xff] %v1121_v19 }
 0x2cb   : > { %v1078_v20 = vpop.f32.mrf.mxu3 }
 0x2cc   : > { %v1079_v21 = vadd.f32 %v2093_v58, %v1078_v20 }
 0x2ce   : > { %v1123_v23 = vadd.f32 %v1122_v22, %v1079_v21 }
 0x2d0   : > { %1138 = vst [vmem:[%s2098_s25 + $0x68] sm:$0xff] %v1123_v23 }
 0x2d1   : > { %1654 = shalt.err (!%p1651_p8)
}
 0x2d2   : > { %s1704_s16 = smov 128   ;;  %s1705_s25 = smov 8  }
 0x2d3   : > { %1467 = dma.vmem_to_hbm [thread:$0]  (%p1794_p5), %s1153_s21, 1792, %s1155_s24, %s1140_s13, %s1704_s16, %s1704_s16, %s1705_s25  }
 0x2d4 PF: > { %p1489_p9 = scmp.ge.s32.totalorder %s1697_s12, 2  ;;  %s1169_s28 = sand.u32 1, %s1685_s30  }
 0x2d5   : > { %s1170_s1 = scalar_lea.sflag [#allocation4], %s1169_s28 }
 0x2d6   : > { %p1480_p10 = pnand %p1489_p9, %p1798_p6 }
 0x2d8   : > { %p1481_p11 = pneg %p1480_p10 }
 0x2da   : > { %1680 = dma.done.wait (%p1481_p11), %s1170_s1, 1792  }
 0x2db   : > { %1682 = vsyncadd (%p1481_p11), %s1170_s1, 4294965504  ;;  %p21_p12 = scmp.ge.s32.totalorder %s1781_s15, 4   ;;  %s2179_s30 = smov %s1689_s10 }
 0x2dc   : > { %s2180_s10 = smov %s1693_s11  ;;  %s2181_s11 = smov %s1792_s18 }
 0x2dd   : > { %s2182_s12 = smov %s1781_s15  ;;  %23 = sbr.rel (!%p21_p12) target bundleno = 8 (0x8), region = 105 }
 0x2e2   :  { %1176 = vsyncpa [#allocation3], 1 }
 0x2e3   :  { %1178 = vsyncpa [#allocation3 + $0x1], 1 }
 0x2e4   :  { %1179 = vsyncpa [#allocation6], 1 }
 0x2e5   :  { %1180 = vsyncpa [#allocation4], 1 }
 0x2e6   :  { %1182 = vsyncpa [#allocation4 + $0x1], 1 }

// kernel: tpu_custom_call.1
= control target key start
LH: loop header
LB: loop body
LE: loop exit
PB: predicated region body
PF: predicated region fallthrough
CT: control target
= control target key end

     0   :  { %s2161_s0 = inlined_call_operand.vmem [shape: f32[224,16], index: 0, kind: input, shape index: {}]   ;;  %s2162_s1 = inlined_call_operand.hbm [shape: bf16[16,128], index: 1, kind: input, shape index: {}]   ;;  %s2163_s2 = inlined_call_operand.hbm [shape: f32[1,128], index: 2, kind: input, shape index: {}]   ;;  %s2164_s3 = inlined_call_operand.vmem [shape: bf16[2,128,128], index: 3, kind: input, shape index: {}]   ;;  %s2165_s4 = inlined_call_operand.vmem [shape: f32[2,128], index: 4, kind: input, shape index: {}]   ;;  %s2166_s5 = inlined_call_operand.hbm [shape: f32[2,128], index: 5, kind: input, shape index: {}]   ;;  %s2167_s6 = inlined_call_operand.vmem [shape: f32[2,128], index: 6, kind: input, shape index: {}]   ;;  %s2168_s7 = inlined_call_operand.vmem [shape: bf16[256,128], index: 7, kind: input, shape index: {}]   ;;  %s2169_s8 = inlined_call_operand.vmem [shape: f32[1,128], index: 8, kind: input, shape index: {}]   ;;  %s2170_s9 = inlined_call_operand.hbm [shape: f32[224,128], index: 9, kind: output, shape index: {}]  }
   0x1   :  { %2171 = sst [smem:[#allocation12_spill]] %s2162_s1 }
   0x2   :  { %2172 = sst [smem:[#allocation13_spill]] %s2163_s2 }
   0x3   :  { %14 = vsyncpa [#allocation3], 0 }
   0x4   :  { %15 = vsyncpa [#allocation6], 0 }
   0x5   :  { %16 = vsyncpa [#allocation4], 0 }
   0x6   :  { %18 = vsyncpa [#allocation4 + $0x1], 0  ;;  %s1756_s30 = smov 0   ;;  %s1758_s10 = smov 0  }
   0x7   :  { %s1760_s11 = smov 0   ;;  %s1762_s12 = smov 0  }
   0x8 LB: > { %s1777_s13 = sadd.s32 4294967295, %s1697_s12   ;;  %s1248_s14 = sadd.s32 4294967294, %s1697_s12   ;;  %s1697_s12 = sphi %s1762_s12, %s2182_s12   ;;  %s1693_s11 = sphi %s1760_s11, %s2181_s11   ;;  %s1689_s10 = sphi %s1758_s10, %s2180_s10   ;;  %s1685_s30 = sphi %s1756_s30, %s2179_s30  }
   0x9   : > { %s1781_s15 = sadd.s32 1, %s1697_s12   ;;  %s225_s16 = sadd.s32 1, %s1693_s11 }
   0xa   : > { %s222_s17 = ssub.s32 %s1697_s12, %s1781_s15  ;;  %p235_p0 = scmp.ne.s32.totalorder %s1693_s11, %s1689_s10 }
   0xb   : > { %p223_p1 = scmp.eq.s32.totalorder %s222_s17, 0  ;;  %p236_p2 = scmp.eq.s32.totalorder %s1777_s13, 1 }
   0xc   : > { %p241_p3 = scmp.ne.s32.totalorder %s1689_s10, %s1685_s30  ;;  %p242_p4 = scmp.eq.s32.totalorder %s1248_s14, 1 }
   0xd   : > { %s1792_s18 = scalar_select %p223_p1, %s1693_s11, %s225_s16  }
   0xe   : > { %p1794_p5 = por %p236_p2, %p235_p0  ;;  %p1798_p6 = por %p242_p4, %p241_p3 }
   0xf   : > { %p1249_p7 = scmp.ge.s32.totalorder %s1697_s12, 1  ;;  %p249_p8 = scmp.lt.s32.totalorder %s1697_s12, 3 }
  0x10   : > { %p1483_p9 = scmp.eq.s32.totalorder %s1777_s13, 0  ;;  %s2176_s2 = sld [smem:[#allocation13_spill]] }
  0x11   : > { %p1805_p10 = pnand %p1249_p7, %p249_p8  ;;  %s1699_s25 = smov [#allocation5]  }
  0x12   : > { %s277_s26 = sshll.u32 %s1699_s25, 4  ;;  %s2177_s1 = sld [smem:[#allocation12_spill]]  ;;  %s278_s26 = int_to_ptr.vmem [resolvable:$true] %s277_s26 }
  0x13   : > { %p1469_p11 = pneg %p1805_p10  ;;  %s1700_s16 = smov [#allocation2]  }
  0x14   : > { %s262_s17 = sshll.u32 %s1700_s16, 4  ;;  %s1701_s22 = smov 64   ;;  %s263_s17 = int_to_ptr.vmem [resolvable:$true] %s262_s17 }
  0x15   : > { %p1819_p12 = pnand %p1483_p9, %p1469_p11  ;;  %s1702_s23 = smov 4  }
  0x16   : > { %s275_s24 = sshll.u32 %s2176_s2, 4  ;;  %s293_s28 = sshll.u32 %s2166_s5, 4  ;;  %s276_s24 = int_to_ptr.hbm [resolvable:$true] %s275_s24  ;;  %s294_s28 = int_to_ptr.hbm [resolvable:$true] %s293_s28 }
  0x17   : > { %1475 = dma.hbm_to_vmem [thread:$0]  (!%p1819_p12), %s276_s24, 16, %s278_s26, [#allocation6]  }
  0x18   : > { %s260_s29 = sshll.u32 %s2177_s1, 4  ;;  %s1703_s1 = smov [#allocation7]   ;;  %s261_s29 = int_to_ptr.hbm [resolvable:$true] %s260_s29 }
  0x19   : > { %1472 = dma.hbm_to_vmem [thread:$0]  (!%p1819_p12), %s261_s29, 128, %s263_s17, [#allocation3], %s1701_s22, %s1701_s22, %s1702_s23  }
  0x1a   : > { %s295_s2 = sshll.u32 %s1703_s1, 4  ;;  %326 = sbr.rel (%p1805_p10) target bundleno = 724 (0x2d4), region = 56  ;;  %s296_s2 = int_to_ptr.vmem [resolvable:$true] %s295_s2 }
  0x1b   : > { %1478 = dma.hbm_to_vmem [thread:$0]  (!%p1819_p12), %s294_s28, 32, %s296_s2, [#allocation6]  }
  0x1f   : > { %1672 = dma.done.wait (%p1483_p9), [#allocation3], 128  }
  0x20   : > { %1674 = vsyncadd (%p1483_p9), [#allocation3], 4294967168 }
  0x21   : > { %1676 = dma.done.wait (%p1483_p9), [#allocation6], 48  }
  0x22   : > { %1678 = vsyncadd (%p1483_p9), [#allocation6], 4294967248  ;;  %s373_s1 = smul.u32 14, %s1777_s13  ;;  %v1417_v0 = vld [vmem:[#allocation2] sm:$0xff]  ;;  %v1425_v1 = vld [vmem:[%s2164_s3 + $0x38] sm:$0xff]  ;;  %vm414_vm0 = vcmask 130048  }
  0x23   : > { %443 = vmatpush.bf16.msra.mxu0 %v1417_v0  ;;  %1451 = vmatpush.bf16.msra.mxu1 %v1417_v0  ;;  %v1424_v10 = vld [vmem:[%s2164_s3 + $0x30] sm:$0xff]  ;;  %v1423_v15 = vld [vmem:[%s2164_s3 + $0x28] sm:$0xff]  ;;  %v1422_v16 = vld [vmem:[%s2164_s3 + $0x20] sm:$0xff]  ;;  %s370_s16 = sand.u32 1, %s1689_s10   ;;  %s1450_s27 = smul.u32 112, %s1777_s13 }
  0x24   : > { %p374_p13 = scmp.lt.s32.totalorder %s373_s1, 27  ;;  %1452 = vmatpush.bf16.msra.mxu2 %v1417_v0  ;;  %1453 = vmatpush.bf16.msra.mxu3 %v1417_v0  ;;  %v1421_v26 = vld [vmem:[%s2164_s3 + $0x18] sm:$0xff]  ;;  %v1420_v27 = vld [vmem:[%s2164_s3 + $0x10] sm:$0xff]  ;;  %v1419_v28 = vld [vmem:[%s2164_s3 + $0x8] sm:$0xff]  ;;  %s1454_s23 = smul.u32 112, %s370_s16 }
  0x25   : > { %v1418_v29 = vld [vmem:[%s2164_s3] sm:$0xff]  ;;  %v1893_v31 = vld [vmem:[#allocation5] ss:$0 sm:$0xff]  ;;  %s1140_s13 = scalar_lea.sflag [#allocation4], %s370_s16  ;;  %s1647_s22 = scalar_lea.hbm %s2170_s9, 224 }
  0x26   : > { %s2184_s1 = smov (!%p374_p13, %s373_s1), 27  ;;  %s2098_s25 = scalar_lea.vmem [#allocation8], %s1454_s23 }
  0x27   : > { %s1258_s2 = sshll.u32 %s2184_s1, 3  ;;  %581 = vmatpush.bf16.msrb.mxu1 %v1425_v1  ;;  %s1152_s21 = sshll.u32 %s2098_s25, 4  ;;  %s1153_s21 = int_to_ptr.vmem [resolvable:$true] %s1152_s21 }
  0x28   : > { %s1846_s26 = scalar_lea.vmem %s2161_s0, %s1258_s2  ;;  %s1151_s2 = scalar_lea.hbm %s2170_s9, %s1450_s27 }
  0x29   : > { %v381_v2 = vld [vmem:[%s1846_s26] sm:$0xff]  ;;  %v382_v3 = vld [vmem:[%s1846_s26 + $0x8] sm:$0xff]  ;;  %v383_v17 = vld [vmem:[%s1846_s26 + $0x10] sm:$0xff]  ;;  %s1154_s24 = sshll.u32 %s1151_s2, 4  ;;  %s1155_s24 = int_to_ptr.hbm [resolvable:$true] %s1154_s24 }
  0x2a   : > { %v395_v4 = vpack.c.bf16 %v382_v3, %v381_v2  ;;  %v385_v5 = vld [vmem:[%s1846_s26 + $0x20] sm:$0xff]  ;;  %v386_v6 = vld [vmem:[%s1846_s26 + $0x28] sm:$0xff]  ;;  %v384_v18 = vld [vmem:[%s1846_s26 + $0x18] sm:$0xff] }
  0x2b   : > { %v397_v7 = vpack.c.bf16 %v386_v6, %v385_v5  ;;  %v389_v8 = vld [vmem:[%s1846_s26 + $0x40] sm:$0xff]  ;;  %v390_v9 = vld [vmem:[%s1846_s26 + $0x48] sm:$0xff]  ;;  %582 = vmatpush.bf16.msrb.mxu1 %v1424_v10  ;;  %v387_v19 = vld [vmem:[%s1846_s26 + $0x30] sm:$0xff]  ;;  %v396_v23 = vpack.c.bf16 %v384_v18, %v383_v17 }
  0x2c   : > { %1263 = vmatmul.msk.bf16.vlgmr.msra.gmra.mxu0 %vm414_vm0, %v395_v4  ;;  %v399_v11 = vpack.c.bf16 %v390_v9, %v389_v8  ;;  %v393_v12 = vld [vmem:[%s1846_s26 + $0x60] sm:$0xff]  ;;  %v394_v13 = vld [vmem:[%s1846_s26 + $0x68] sm:$0xff]  ;;  %v388_v20 = vld [vmem:[%s1846_s26 + $0x38] sm:$0xff] }
  0x2d   : > { %1265 = vmatmul.msk.bf16.vlgmr.msra.gmra.mxu1 %vm414_vm0, %v397_v7  ;;  %v401_v14 = vpack.c.bf16 %v394_v13, %v393_v12  ;;  %v391_v21 = vld [vmem:[%s1846_s26 + $0x50] sm:$0xff]  ;;  %v392_v22 = vld [vmem:[%s1846_s26 + $0x58] sm:$0xff]  ;;  %v398_v24 = vpack.c.bf16 %v388_v20, %v387_v19  ;;  %s1641_s26 = sshra.s32 %s1155_s24, 4  ;;  %s1642_s26 = int_to_ptr.hbm [resolvable:$true] %s1641_s26 }
  0x2e   : > { %1267 = vmatmul.msk.bf16.vlgmr.msra.gmra.mxu2 %vm414_vm0, %v399_v11  ;;  %v400_v25 = vpack.c.bf16 %v392_v22, %v391_v21  ;;  %v1432_v17 = vld [vmem:[%s2164_s3 + $0x70] sm:$0xff]  ;;  %v1431_v21 = vld [vmem:[%s2164_s3 + $0x68] sm:$0xff]  ;;  %s1643_s29 = scalar_lea.hbm %s1642_s26, 112  ;;  %p1648_p3 = scmp.lt.s32.totalorder %s1642_s26, %s2170_s9 }
  0x2f   : > { %1269 = vmatmul.msk.bf16.vlgmr.msra.gmra.mxu3 %vm414_vm0, %v401_v14  ;;  %583 = vmatpush.bf16.msrb.mxu1 %v1423_v15  ;;  %v1433_v14 = vld [vmem:[%s2164_s3 + $0x78] sm:$0xff]  ;;  %p1644_p0 = scmp.ne.s32.totalorder %s1642_s26, %s1643_s29  ;;  %p1649_p4 = scmp.lt.s32.totalorder %s1647_s22, %s1643_s29 }
  0x30   : > { %727 = vmatpush.bf16.msrb.mxu2 %v1433_v14 }
  0x31   : > { %p1645_p1 = pnand %p1644_p0, %p1794_p5  ;;  %p1650_p7 = por %p1649_p4, %p1648_p3 }
  0x33   : > { %584 = vmatpush.bf16.msrb.mxu1 %v1422_v16  ;;  %p1646_p2 = pneg %p1645_p1 }
  0x34   : > { %728 = vmatpush.bf16.msrb.mxu2 %v1432_v17 }
  0x35   : > { %p1651_p8 = pnand %p1650_p7, %p1646_p2 }
  0x37   : > { %585 = vmatpush.bf16.msrb.mxu1 %v1421_v26 }
  0x38   : > { %729 = vmatpush.bf16.msrb.mxu2 %v1431_v21  ;;  %v1441_v21 = vld [vmem:[%s2168_s7 + $0x38] sm:$0xff] }
  0x39   : > { %1037 = vmatpush.bf16.msrb.mxu3 %v1441_v21 }
  0x3b   : > { %586 = vmatpush.bf16.msrb.mxu1 %v1420_v27 }
  0x3c   : > { %1264 = vmatmul.msk.bf16.gmra.mxu0 %vm414_vm0, %v396_v23 }
  0x3d   : > { %1266 = vmatmul.msk.bf16.gmra.mxu1 %vm414_vm0, %v398_v24  ;;  %v1430_v24 = vld [vmem:[%s2164_s3 + $0x60] sm:$0xff] }
  0x3e   : > { %1268 = vmatmul.msk.bf16.gmra.mxu2 %vm414_vm0, %v400_v25 }
  0x3f   : > { %587 = vmatpush.bf16.msrb.mxu1 %v1419_v28  ;;  %730 = vmatpush.bf16.msrb.mxu2 %v1430_v24  ;;  %v1448_v24 = vld [vmem:[%s2168_s7 + $0x70] sm:$0xff] }
  0x43   : > { %588 = vmatpush.bf16.msrb.mxu1 %v1418_v29 }
  0xa9   : > { %v445_v30 = vpop.f32.mrf.mxu0 }
  0xaa   : > { %v446_v32 = vadd.f32 %v1893_v31, %v445_v30  ;;  %v455_v41 = vpop.f32.mrf.mxu1 }
  0xab   : > { %v456_v51 = vadd.f32 %v1893_v31, %v455_v41 }
  0xac   : > { %v480_v34 = vmul.f32 0.01, %v446_v32 }
  0xad   : > { %v484_v54 = vmul.f32 0.01, %v456_v51 }
  0xae   : > { %v494_v37 = vmax.f32 %v446_v32, %v480_v34  ;;  %v1429_v34 = vld [vmem:[%s2164_s3 + $0x58] sm:$0xff] }
  0xaf   : > { %v498_v56 = vmax.f32 %v456_v51, %v484_v54  ;;  %731 = vmatpush.bf16.msrb.mxu2 %v1429_v34 }
  0xb1   : > { %v447_v33 = vpop.f32.mrf.mxu0  ;;  %v465_v60 = vpop.f32.mrf.mxu2 }
  0xb2   : > { %v448_v35 = vadd.f32 %v1893_v31, %v447_v33  ;;  %v457_v47 = vpop.f32.mrf.mxu1  ;;  %v466_v5 = vadd.f32 %v1893_v31, %v465_v60  ;;  %v475_v18 = vpop.f32.mrf.mxu3 }
  0xb3   : > { %v458_v52 = vadd.f32 %v1893_v31, %v457_v47  ;;  %v476_v27 = vadd.f32 %v1893_v31, %v475_v18 }
  0xb4   : > { %v481_v36 = vmul.f32 0.01, %v448_v35  ;;  %v488_v8 = vmul.f32 0.01, %v466_v5 }
  0xb5   : > { %v485_v55 = vmul.f32 0.01, %v458_v52  ;;  %v492_v29 = vmul.f32 0.01, %v476_v27 }
  0xb6   : > { %v495_v38 = vmax.f32 %v448_v35, %v481_v36  ;;  %v502_v10 = vmax.f32 %v466_v5, %v488_v8  ;;  %v1428_v36 = vld [vmem:[%s2164_s3 + $0x50] sm:$0xff] }
  0xb7   : > { %v499_v57 = vmax.f32 %v458_v52, %v485_v55  ;;  %v506_v32 = vmax.f32 %v476_v27, %v492_v29  ;;  %732 = vmatpush.bf16.msrb.mxu2 %v1428_v36  ;;  %v1447_v27 = vld [vmem:[%s2168_s7 + $0x68] sm:$0xff] }
  0xb8   : > { %v508_v39 = vpack.c.bf16 %v495_v38, %v494_v37  ;;  %v1426_v37 = vld [vmem:[%s2164_s3 + $0x40] sm:$0xff] }
  0xb9   : > { %v450_v40 = vpop.f32.mrf.mxu0  ;;  %v510_v58 = vpack.c.bf16 %v499_v57, %v498_v56  ;;  %v467_v3 = vpop.f32.mrf.mxu2 }
  0xba   : > { %589 = vmatmul.bf16.vlgmr.msrb.gmra.mxu1 %v508_v39  ;;  %v451_v42 = vadd.f32 %v1893_v31, %v450_v40  ;;  %v460_v53 = vpop.f32.mrf.mxu1  ;;  %v468_v6 = vadd.f32 %v1893_v31, %v467_v3  ;;  %v477_v26 = vpop.f32.mrf.mxu3  ;;  %v1936_v39 = vld [vmem:[%s2165_s4] ss:$0 sm:$0xff] }
  0xbb   : > { %v461_v61 = vadd.f32 %v1893_v31, %v460_v53  ;;  %v478_v28 = vadd.f32 %v1893_v31, %v477_v26  ;;  %v1439_v26 = vld [vmem:[%s2168_s7 + $0x28] sm:$0xff] }
  0xbc   : > { %v482_v44 = vmul.f32 0.01, %v451_v42  ;;  %v489_v9 = vmul.f32 0.01, %v468_v6 }
  0xbd   : > { %v486_v63 = vmul.f32 0.01, %v461_v61  ;;  %v493_v30 = vmul.f32 0.01, %v478_v28 }
  0xbe   : > { %v496_v48 = vmax.f32 %v451_v42, %v482_v44  ;;  %v503_v11 = vmax.f32 %v468_v6, %v489_v9 }
  0xbf   : > { %v500_v1 = vmax.f32 %v461_v61, %v486_v63  ;;  %v507_v33 = vmax.f32 %v478_v28, %v493_v30 }
  0xc0   : > { %v512_v12 = vpack.c.bf16 %v503_v11, %v502_v10 }
  0xc1   : > { %v452_v43 = vpop.f32.mrf.mxu0  ;;  %v470_v7 = vpop.f32.mrf.mxu2  ;;  %v514_v35 = vpack.c.bf16 %v507_v33, %v506_v32 }
  0xc2   : > { %v453_v45 = vadd.f32 %v1893_v31, %v452_v43  ;;  %v462_v59 = vpop.f32.mrf.mxu1  ;;  %v471_v15 = vadd.f32 %v1893_v31, %v470_v7 }
  0xc3   : > { %v463_v62 = vadd.f32 %v1893_v31, %v462_v59 }
  0xc4   : > { %v483_v46 = vmul.f32 0.01, %v453_v45  ;;  %v490_v19 = vmul.f32 0.01, %v471_v15 }
  0xc5   : > { %v487_v0 = vmul.f32 0.01, %v463_v62 }
  0xc6   : > { %v497_v49 = vmax.f32 %v453_v45, %v483_v46  ;;  %v504_v22 = vmax.f32 %v471_v15, %v490_v19 }
  0xc7   : > { %v501_v2 = vmax.f32 %v463_v62, %v487_v0 }
  0xc8   : > { %v509_v50 = vpack.c.bf16 %v497_v49, %v496_v48 }
  0xc9   : > { %v511_v4 = vpack.c.bf16 %v501_v2, %v500_v1  ;;  %v472_v13 = vpop.f32.mrf.mxu2 }
  0xca   : > { %594 = vmatmul.bf16.gmra.mxu1 %v509_v50  ;;  %v473_v16 = vadd.f32 %v1893_v31, %v472_v13  ;;  %v1427_v31 = vld [vmem:[%s2164_s3 + $0x48] sm:$0xff] }
  0xcb   : > { %733 = vmatpush.bf16.msrb.mxu2 %v1427_v31 }
  0xcc   : > { %v491_v20 = vmul.f32 0.01, %v473_v16 }
  0xce   : > { %v505_v23 = vmax.f32 %v473_v16, %v491_v20 }
  0xcf   : > { %734 = vmatpush.bf16.msrb.mxu2 %v1426_v37 }
  0xd0   : > { %v513_v25 = vpack.c.bf16 %v505_v23, %v504_v22  ;;  %v1449_v22 = vld [vmem:[%s2168_s7 + $0x78] sm:$0xff]  ;;  %v1440_v23 = vld [vmem:[%s2168_s7 + $0x30] sm:$0xff] }
  0xd1   : > { %1081 = vmatpush.bf16.msrb.mxu0 %v1449_v22  ;;  %1038 = vmatpush.bf16.msrb.mxu3 %v1440_v23 }
  0xd5   : > { %1082 = vmatpush.bf16.msrb.mxu0 %v1448_v24  ;;  %1039 = vmatpush.bf16.msrb.mxu3 %v1439_v26 }
  0xd9   : > { %1083 = vmatpush.bf16.msrb.mxu0 %v1447_v27 }
  0xda   : > { %599 = vmatmul.bf16.gmra.mxu1 %v510_v58 }
  0xea   : > { %604 = vmatmul.bf16.gmra.mxu1 %v511_v4 }
  0xfa   : > { %609 = vmatmul.bf16.gmra.mxu1 %v512_v12 }
 0x10a   : > { %614 = vmatmul.bf16.gmra.mxu1 %v513_v25 }
 0x11a   : > { %619 = vmatmul.bf16.gmra.mxu1 %v514_v35 }
 0x137   : > { %v590_v38 = vpop.f32.mrf.mxu1 }
 0x138   : > { %v591_v40 = vadd.f32 %v1936_v39, %v590_v38 }
 0x13a   : > { %v625_v42 = vmul.f32 0.01, %v591_v40 }
 0x13c   : > { %v639_v45 = vmax.f32 %v591_v40, %v625_v42 }
 0x13f   : > { %v592_v41 = vpop.f32.mrf.mxu1 }
 0x140   : > { %v593_v43 = vadd.f32 %v1936_v39, %v592_v41 }
 0x142   : > { %v626_v44 = vmul.f32 0.01, %v593_v43 }
 0x144   : > { %v640_v46 = vmax.f32 %v593_v43, %v626_v44 }
 0x146   : > { %v653_v47 = vpack.c.bf16 %v640_v46, %v639_v45  ;;  %v1438_v45 = vld [vmem:[%s2168_s7 + $0x20] sm:$0xff] }
 0x147   : > { %v595_v48 = vpop.f32.mrf.mxu1  ;;  %v1446_v46 = vld [vmem:[%s2168_s7 + $0x60] sm:$0xff]  ;;  %1040 = vmatpush.bf16.msrb.mxu3 %v1438_v45 }
 0x148   : > { %735 = vmatmul.bf16.vlgmr.msrb.gmra.mxu2 %v653_v47  ;;  %v596_v49 = vadd.f32 %v1936_v39, %v595_v48  ;;  %1084 = vmatpush.bf16.msrb.mxu0 %v1446_v46  ;;  %v1437_v47 = vld [vmem:[%s2168_s7 + $0x18] sm:$0xff]  ;;  %v1436_v48 = vld [vmem:[%s2168_s7 + $0x10] sm:$0xff] }
 0x14a   : > { %v627_v51 = vmul.f32 0.01, %v596_v49 }
 0x14b   : > { %1041 = vmatpush.bf16.msrb.mxu3 %v1437_v47 }
 0x14c   : > { %v641_v54 = vmax.f32 %v596_v49, %v627_v51  ;;  %v1444_v49 = vld [vmem:[%s2168_s7 + $0x50] sm:$0xff]  ;;  %v1443_v51 = vld [vmem:[%s2168_s7 + $0x48] sm:$0xff] }
 0x14f   : > { %v597_v50 = vpop.f32.mrf.mxu1  ;;  %1042 = vmatpush.bf16.msrb.mxu3 %v1436_v48 }
 0x150   : > { %v598_v52 = vadd.f32 %v1936_v39, %v597_v50  ;;  %v1435_v50 = vld [vmem:[%s2168_s7 + $0x8] sm:$0xff] }
 0x152   : > { %v628_v53 = vmul.f32 0.01, %v598_v52 }
 0x153   : > { %1043 = vmatpush.bf16.msrb.mxu3 %v1435_v50 }
 0x154   : > { %v642_v55 = vmax.f32 %v598_v52, %v628_v53  ;;  %v1434_v52 = vld [vmem:[%s2168_s7] sm:$0xff] }
 0x155   : > { %v1442_v53 = vld [vmem:[%s2168_s7 + $0x40] sm:$0xff] }
 0x156   : > { %v654_v56 = vpack.c.bf16 %v642_v55, %v641_v54  ;;  %v2003_v54 = vld [vmem:[%s2165_s4 + $0x1] ss:$0 sm:$0xff] }
 0x157   : > { %v600_v57 = vpop.f32.mrf.mxu1  ;;  %1044 = vmatpush.bf16.msrb.mxu3 %v1434_v52 }
 0x158   : > { %740 = vmatmul.bf16.gmra.mxu2 %v654_v56  ;;  %v601_v58 = vadd.f32 %v1936_v39, %v600_v57  ;;  %v2005_v56 = vld [vmem:[#allocation7] ss:$0 sm:$0xff] }
 0x15a   : > { %v629_v60 = vmul.f32 0.01, %v601_v58 }
 0x15c   : > { %v643_v63 = vmax.f32 %v601_v58, %v629_v60  ;;  %v2008_v58 = vld [vmem:[#allocation7 + $0x1] ss:$0 sm:$0xff]  ;;  %v2014_v60 = vld [vmem:[%s2167_s6] ss:$0 sm:$0xff] }
 0x15f   : > { %v602_v59 = vpop.f32.mrf.mxu1 }
 0x160   : > { %v603_v61 = vadd.f32 %v1936_v39, %v602_v59 }
 0x162   : > { %v630_v62 = vmul.f32 0.01, %v603_v61 }
 0x164   : > { %v644_v0 = vmax.f32 %v603_v61, %v630_v62  ;;  %v2020_v62 = vld [vmem:[%s2167_s6 + $0x1] ss:$0 sm:$0xff] }
 0x166   : > { %v655_v1 = vpack.c.bf16 %v644_v0, %v643_v63 }
 0x167   : > { %v605_v2 = vpop.f32.mrf.mxu1 }
 0x168   : > { %745 = vmatmul.bf16.gmra.mxu2 %v655_v1  ;;  %v606_v3 = vadd.f32 %v1936_v39, %v605_v2 }
 0x16a   : > { %v631_v5 = vmul.f32 0.01, %v606_v3 }
 0x16c   : > { %v645_v8 = vmax.f32 %v606_v3, %v631_v5 }
 0x16f   : > { %v607_v4 = vpop.f32.mrf.mxu1 }
 0x170   : > { %v608_v6 = vadd.f32 %v1936_v39, %v607_v4 }
 0x172   : > { %v632_v7 = vmul.f32 0.01, %v608_v6 }
 0x174   : > { %v646_v9 = vmax.f32 %v608_v6, %v632_v7 }
 0x176   : > { %v656_v10 = vpack.c.bf16 %v646_v9, %v645_v8 }
 0x177   : > { %v610_v11 = vpop.f32.mrf.mxu1 }
 0x178   : > { %750 = vmatmul.bf16.gmra.mxu2 %v656_v10  ;;  %v611_v12 = vadd.f32 %v1936_v39, %v610_v11 }
 0x17a   : > { %v633_v14 = vmul.f32 0.01, %v611_v12 }
 0x17c   : > { %v647_v17 = vmax.f32 %v611_v12, %v633_v14 }
 0x17f   : > { %v612_v13 = vpop.f32.mrf.mxu1 }
 0x180   : > { %v613_v15 = vadd.f32 %v1936_v39, %v612_v13 }
 0x182   : > { %v634_v16 = vmul.f32 0.01, %v613_v15 }
 0x184   : > { %v648_v18 = vmax.f32 %v613_v15, %v634_v16 }
 0x186   : > { %v657_v19 = vpack.c.bf16 %v648_v18, %v647_v17 }
 0x187   : > { %v615_v20 = vpop.f32.mrf.mxu1 }
 0x188   : > { %755 = vmatmul.bf16.gmra.mxu2 %v657_v19  ;;  %v616_v25 = vadd.f32 %v1936_v39, %v615_v20 }
 0x18a   : > { %v635_v29 = vmul.f32 0.01, %v616_v25 }
 0x18c   : > { %v649_v33 = vmax.f32 %v616_v25, %v635_v29 }
 0x18f   : > { %v617_v28 = vpop.f32.mrf.mxu1 }
 0x190   : > { %v618_v30 = vadd.f32 %v1936_v39, %v617_v28 }
 0x192   : > { %v636_v32 = vmul.f32 0.01, %v618_v30 }
 0x194   : > { %v650_v34 = vmax.f32 %v618_v30, %v636_v32 }
 0x196   : > { %v658_v35 = vpack.c.bf16 %v650_v34, %v649_v33 }
 0x197   : > { %v620_v36 = vpop.f32.mrf.mxu1 }
 0x198   : > { %760 = vmatmul.bf16.gmra.mxu2 %v658_v35  ;;  %v621_v31 = vadd.f32 %v1936_v39, %v620_v36 }
 0x19a   : > { %v637_v38 = vmul.f32 0.01, %v621_v31 }
 0x19c   : > { %v651_v42 = vmax.f32 %v621_v31, %v637_v38 }
 0x19f   : > { %v622_v37 = vpop.f32.mrf.mxu1 }
 0x1a0   : > { %v623_v40 = vadd.f32 %v1936_v39, %v622_v37  ;;  %v1445_v39 = vld [vmem:[%s2168_s7 + $0x58] sm:$0xff] }
 0x1a1   : > { %1085 = vmatpush.bf16.msrb.mxu0 %v1445_v39 }
 0x1a2   : > { %v638_v41 = vmul.f32 0.01, %v623_v40 }
 0x1a4   : > { %v652_v43 = vmax.f32 %v623_v40, %v638_v41 }
 0x1a5   : > { %1086 = vmatpush.bf16.msrb.mxu0 %v1444_v49 }
 0x1a6   : > { %v659_v44 = vpack.c.bf16 %v652_v43, %v651_v42 }
 0x1a8   : > { %765 = vmatmul.bf16.gmra.mxu2 %v659_v44 }
 0x1a9   : > { %1087 = vmatpush.bf16.msrb.mxu0 %v1443_v51 }
 0x1ad   : > { %1088 = vmatpush.bf16.msrb.mxu0 %v1442_v53 }
 0x1cb   : > { %v736_v55 = vpop.f32.mrf.mxu2 }
 0x1cc   : > { %v737_v57 = vadd.f32 %v2003_v54, %v736_v55 }
 0x1ce   : > { %v773_v59 = vmul.f32 %v2005_v56, %v737_v57  ;;  %v833_v61 = vmul.f32 %v2008_v58, %v737_v57 }
 0x1d0   : > { %v789_v63 = vadd.f32 %v2014_v60, %v773_v59  ;;  %v849_v1 = vadd.f32 %v2020_v62, %v833_v61 }
 0x1d2   : > { %v803_v5 = vmul.f32 0.01, %v789_v63  ;;  %v863_v6 = vmul.f32 0.01, %v849_v1 }
 0x1d3   : > { %v738_v0 = vpop.f32.mrf.mxu2 }
 0x1d4   : > { %v739_v2 = vadd.f32 %v2003_v54, %v738_v0  ;;  %v817_v12 = vmax.f32 %v789_v63, %v803_v5  ;;  %v877_v15 = vmax.f32 %v849_v1, %v863_v6 }
 0x1d6   : > { %v774_v3 = vmul.f32 %v2005_v56, %v739_v2  ;;  %v834_v4 = vmul.f32 %v2008_v58, %v739_v2 }
 0x1d8   : > { %v790_v7 = vadd.f32 %v2014_v60, %v774_v3  ;;  %v850_v8 = vadd.f32 %v2020_v62, %v834_v4 }
 0x1da   : > { %v804_v9 = vmul.f32 0.01, %v790_v7  ;;  %v864_v10 = vmul.f32 0.01, %v850_v8 }
 0x1db   : > { %v741_v11 = vpop.f32.mrf.mxu2 }
 0x1dc   : > { %v742_v13 = vadd.f32 %v2003_v54, %v741_v11  ;;  %v818_v14 = vmax.f32 %v790_v7, %v804_v9  ;;  %v878_v16 = vmax.f32 %v850_v8, %v864_v10 }
 0x1de   : > { %v891_v17 = vpack.c.bf16 %v818_v14, %v817_v12  ;;  %v892_v18 = vpack.c.bf16 %v878_v16, %v877_v15  ;;  %v775_v19 = vmul.f32 %v2005_v56, %v742_v13  ;;  %v835_v20 = vmul.f32 %v2008_v58, %v742_v13 }
 0x1e0   : > { %1045 = vmatmul.bf16.vlgmr.msrb.gmra.mxu3 %v891_v17  ;;  %1089 = vmatmul.bf16.vlgmr.msrb.gmra.mxu0 %v892_v18  ;;  %v791_v21 = vadd.f32 %v2014_v60, %v775_v19  ;;  %v851_v23 = vadd.f32 %v2020_v62, %v835_v20 }
 0x1e2   : > { %v805_v27 = vmul.f32 0.01, %v791_v21  ;;  %v865_v30 = vmul.f32 0.01, %v851_v23 }
 0x1e3   : > { %v743_v22 = vpop.f32.mrf.mxu2 }
 0x1e4   : > { %v744_v24 = vadd.f32 %v2003_v54, %v743_v22  ;;  %v819_v35 = vmax.f32 %v791_v21, %v805_v27  ;;  %v879_v37 = vmax.f32 %v851_v23, %v865_v30 }
 0x1e6   : > { %v776_v25 = vmul.f32 %v2005_v56, %v744_v24  ;;  %v836_v26 = vmul.f32 %v2008_v58, %v744_v24 }
 0x1e8   : > { %v792_v28 = vadd.f32 %v2014_v60, %v776_v25  ;;  %v852_v29 = vadd.f32 %v2020_v62, %v836_v26 }
 0x1ea   : > { %v806_v32 = vmul.f32 0.01, %v792_v28  ;;  %v866_v33 = vmul.f32 0.01, %v852_v29 }
 0x1eb   : > { %v746_v34 = vpop.f32.mrf.mxu2 }
 0x1ec   : > { %v747_v36 = vadd.f32 %v2003_v54, %v746_v34  ;;  %v820_v31 = vmax.f32 %v792_v28, %v806_v32  ;;  %v880_v38 = vmax.f32 %v852_v29, %v866_v33 }
 0x1ee   : > { %v893_v40 = vpack.c.bf16 %v820_v31, %v819_v35  ;;  %v894_v41 = vpack.c.bf16 %v880_v38, %v879_v37  ;;  %v777_v42 = vmul.f32 %v2005_v56, %v747_v36  ;;  %v837_v43 = vmul.f32 %v2008_v58, %v747_v36 }
 0x1f0   : > { %1050 = vmatmul.bf16.gmra.mxu3 %v893_v40  ;;  %1094 = vmatmul.bf16.gmra.mxu0 %v894_v41  ;;  %v793_v44 = vadd.f32 %v2014_v60, %v777_v42  ;;  %v853_v46 = vadd.f32 %v2020_v62, %v837_v43 }
 0x1f2   : > { %v807_v49 = vmul.f32 0.01, %v793_v44  ;;  %v867_v52 = vmul.f32 0.01, %v853_v46 }
 0x1f3   : > { %v748_v45 = vpop.f32.mrf.mxu2 }
 0x1f4   : > { %v749_v47 = vadd.f32 %v2003_v54, %v748_v45  ;;  %v821_v59 = vmax.f32 %v793_v44, %v807_v49  ;;  %v881_v0 = vmax.f32 %v853_v46, %v867_v52 }
 0x1f6   : > { %v778_v39 = vmul.f32 %v2005_v56, %v749_v47  ;;  %v838_v48 = vmul.f32 %v2008_v58, %v749_v47 }
 0x1f8   : > { %v794_v50 = vadd.f32 %v2014_v60, %v778_v39  ;;  %v854_v51 = vadd.f32 %v2020_v62, %v838_v48 }
 0x1fa   : > { %v808_v53 = vmul.f32 0.01, %v794_v50  ;;  %v868_v55 = vmul.f32 0.01, %v854_v51 }
 0x1fb   : > { %v751_v57 = vpop.f32.mrf.mxu2 }
 0x1fc   : > { %v752_v61 = vadd.f32 %v2003_v54, %v751_v57  ;;  %v822_v63 = vmax.f32 %v794_v50, %v808_v53  ;;  %v882_v1 = vmax.f32 %v854_v51, %v868_v55 }
 0x1fe   : > { %v895_v2 = vpack.c.bf16 %v822_v63, %v821_v59  ;;  %v896_v3 = vpack.c.bf16 %v882_v1, %v881_v0  ;;  %v779_v4 = vmul.f32 %v2005_v56, %v752_v61  ;;  %v839_v5 = vmul.f32 %v2008_v58, %v752_v61 }
 0x200   : > { %1055 = vmatmul.bf16.gmra.mxu3 %v895_v2  ;;  %1099 = vmatmul.bf16.gmra.mxu0 %v896_v3  ;;  %v795_v6 = vadd.f32 %v2014_v60, %v779_v4  ;;  %v855_v8 = vadd.f32 %v2020_v62, %v839_v5 }
 0x202   : > { %v809_v12 = vmul.f32 0.01, %v795_v6  ;;  %v869_v15 = vmul.f32 0.01, %v855_v8 }
 0x203   : > { %v753_v7 = vpop.f32.mrf.mxu2 }
 0x204   : > { %v754_v9 = vadd.f32 %v2003_v54, %v753_v7  ;;  %v823_v19 = vmax.f32 %v795_v6, %v809_v12  ;;  %v883_v22 = vmax.f32 %v855_v8, %v869_v15 }
 0x206   : > { %v780_v10 = vmul.f32 %v2005_v56, %v754_v9  ;;  %v840_v11 = vmul.f32 %v2008_v58, %v754_v9 }
 0x208   : > { %v796_v13 = vadd.f32 %v2014_v60, %v780_v10  ;;  %v856_v14 = vadd.f32 %v2020_v62, %v840_v11 }
 0x20a   : > { %v810_v16 = vmul.f32 0.01, %v796_v13  ;;  %v870_v17 = vmul.f32 0.01, %v856_v14 }
 0x20b   : > { %v756_v18 = vpop.f32.mrf.mxu2 }
 0x20c   : > { %v757_v20 = vadd.f32 %v2003_v54, %v756_v18  ;;  %v824_v21 = vmax.f32 %v796_v13, %v810_v16  ;;  %v884_v23 = vmax.f32 %v856_v14, %v870_v17 }
 0x20e   : > { %v897_v24 = vpack.c.bf16 %v824_v21, %v823_v19  ;;  %v898_v25 = vpack.c.bf16 %v884_v23, %v883_v22  ;;  %v781_v26 = vmul.f32 %v2005_v56, %v757_v20  ;;  %v841_v27 = vmul.f32 %v2008_v58, %v757_v20 }
 0x210   : > { %1060 = vmatmul.bf16.gmra.mxu3 %v897_v24  ;;  %1104 = vmatmul.bf16.gmra.mxu0 %v898_v25  ;;  %v797_v28 = vadd.f32 %v2014_v60, %v781_v26  ;;  %v857_v30 = vadd.f32 %v2020_v62, %v841_v27 }
 0x212   : > { %v811_v35 = vmul.f32 0.01, %v797_v28  ;;  %v871_v37 = vmul.f32 0.01, %v857_v30 }
 0x213   : > { %v758_v29 = vpop.f32.mrf.mxu2 }
 0x214   : > { %v759_v32 = vadd.f32 %v2003_v54, %v758_v29  ;;  %v825_v42 = vmax.f32 %v797_v28, %v811_v35  ;;  %v885_v45 = vmax.f32 %v857_v30, %v871_v37 }
 0x216   : > { %v782_v33 = vmul.f32 %v2005_v56, %v759_v32  ;;  %v842_v34 = vmul.f32 %v2008_v58, %v759_v32 }
 0x218   : > { %v798_v36 = vadd.f32 %v2014_v60, %v782_v33  ;;  %v858_v31 = vadd.f32 %v2020_v62, %v842_v34 }
 0x21a   : > { %v812_v38 = vmul.f32 0.01, %v798_v36  ;;  %v872_v40 = vmul.f32 0.01, %v858_v31 }
 0x21b   : > { %v761_v41 = vpop.f32.mrf.mxu2 }
 0x21c   : > { %v762_v43 = vadd.f32 %v2003_v54, %v761_v41  ;;  %v826_v44 = vmax.f32 %v798_v36, %v812_v38  ;;  %v886_v46 = vmax.f32 %v858_v31, %v872_v40 }
 0x21e   : > { %v899_v47 = vpack.c.bf16 %v826_v44, %v825_v42  ;;  %v900_v39 = vpack.c.bf16 %v886_v46, %v885_v45  ;;  %v783_v48 = vmul.f32 %v2005_v56, %v762_v43  ;;  %v843_v49 = vmul.f32 %v2008_v58, %v762_v43 }
 0x220   : > { %1065 = vmatmul.bf16.gmra.mxu3 %v899_v47  ;;  %1109 = vmatmul.bf16.gmra.mxu0 %v900_v39  ;;  %v799_v50 = vadd.f32 %v2014_v60, %v783_v48  ;;  %v859_v52 = vadd.f32 %v2020_v62, %v843_v49 }
 0x222   : > { %v813_v59 = vmul.f32 0.01, %v799_v50  ;;  %v873_v0 = vmul.f32 0.01, %v859_v52 }
 0x223   : > { %v763_v51 = vpop.f32.mrf.mxu2 }
 0x224   : > { %v764_v53 = vadd.f32 %v2003_v54, %v763_v51  ;;  %v827_v4 = vmax.f32 %v799_v50, %v813_v59  ;;  %v887_v7 = vmax.f32 %v859_v52, %v873_v0 }
 0x226   : > { %v784_v55 = vmul.f32 %v2005_v56, %v764_v53  ;;  %v844_v57 = vmul.f32 %v2008_v58, %v764_v53 }
 0x228   : > { %v800_v61 = vadd.f32 %v2014_v60, %v784_v55  ;;  %v860_v63 = vadd.f32 %v2020_v62, %v844_v57 }
 0x22a   : > { %v814_v1 = vmul.f32 0.01, %v800_v61  ;;  %v874_v2 = vmul.f32 0.01, %v860_v63 }
 0x22b   : > { %v766_v3 = vpop.f32.mrf.mxu2 }
 0x22c   : > { %v767_v5 = vadd.f32 %v2003_v54, %v766_v3  ;;  %v828_v6 = vmax.f32 %v800_v61, %v814_v1  ;;  %v888_v8 = vmax.f32 %v860_v63, %v874_v2 }
 0x22e   : > { %v901_v9 = vpack.c.bf16 %v828_v6, %v827_v4  ;;  %v902_v10 = vpack.c.bf16 %v888_v8, %v887_v7  ;;  %v785_v11 = vmul.f32 %v2005_v56, %v767_v5  ;;  %v845_v12 = vmul.f32 %v2008_v58, %v767_v5 }
 0x230   : > { %1070 = vmatmul.bf16.gmra.mxu3 %v901_v9  ;;  %1114 = vmatmul.bf16.gmra.mxu0 %v902_v10  ;;  %v801_v14 = vadd.f32 %v2014_v60, %v785_v11  ;;  %v861_v15 = vadd.f32 %v2020_v62, %v845_v12 }
 0x232   : > { %v815_v21 = vmul.f32 0.01, %v801_v14  ;;  %v875_v22 = vmul.f32 0.01, %v861_v15 }
 0x233   : > { %v768_v13 = vpop.f32.mrf.mxu2 }
 0x234   : > { %v769_v16 = vadd.f32 %v2003_v54, %v768_v13  ;;  %v829_v25 = vmax.f32 %v801_v14, %v815_v21  ;;  %v889_v27 = vmax.f32 %v861_v15, %v875_v22 }
 0x236   : > { %v786_v17 = vmul.f32 %v2005_v56, %v769_v16  ;;  %v846_v18 = vmul.f32 %v2008_v58, %v769_v16  ;;  %v2093_v58 = vld [vmem:[%s2169_s8] ss:$0 sm:$0xff] }
 0x238   : > { %v802_v19 = vadd.f32 %v2014_v60, %v786_v17  ;;  %v862_v20 = vadd.f32 %v2020_v62, %v846_v18 }
 0x23a   : > { %v816_v23 = vmul.f32 0.01, %v802_v19  ;;  %v876_v24 = vmul.f32 0.01, %v862_v20 }
 0x23c   : > { %v830_v26 = vmax.f32 %v802_v19, %v816_v23  ;;  %v890_v28 = vmax.f32 %v862_v20, %v876_v24 }
 0x23e   : > { %v903_v29 = vpack.c.bf16 %v830_v26, %v829_v25  ;;  %v904_v54 = vpack.c.bf16 %v890_v28, %v889_v27 }
 0x240   : > { %1075 = vmatmul.bf16.gmra.mxu3 %v903_v29  ;;  %1119 = vmatmul.bf16.gmra.mxu0 %v904_v54 }
 0x25d   : > { %v1090_v56 = vpop.f32.mrf.mxu0 }
 0x263   : > { %v1046_v60 = vpop.f32.mrf.mxu3 }
 0x264   : > { %v1047_v62 = vadd.f32 %v2093_v58, %v1046_v60 }
 0x265   : > { %v1092_v30 = vpop.f32.mrf.mxu0 }
 0x266   : > { %v1091_v32 = vadd.f32 %v1090_v56, %v1047_v62 }
 0x268   : > { %1125 = vst [vmem:[%s2098_s25] sm:$0xff] %v1091_v32 }
 0x26b   : > { %v1048_v33 = vpop.f32.mrf.mxu3 }
 0x26c   : > { %v1049_v34 = vadd.f32 %v2093_v58, %v1048_v33 }
 0x26d   : > { %v1095_v35 = vpop.f32.mrf.mxu0 }
 0x26e   : > { %v1093_v36 = vadd.f32 %v1092_v30, %v1049_v34 }
 0x270   : > { %1126 = vst [vmem:[%s2098_s25 + $0x8] sm:$0xff] %v1093_v36 }
 0x273   : > { %v1051_v31 = vpop.f32.mrf.mxu3 }
 0x274   : > { %v1052_v37 = vadd.f32 %v2093_v58, %v1051_v31 }
 0x275   : > { %v1097_v38 = vpop.f32.mrf.mxu0 }
 0x276   : > { %v1096_v40 = vadd.f32 %v1095_v35, %v1052_v37 }
 0x278   : > { %1127 = vst [vmem:[%s2098_s25 + $0x10] sm:$0xff] %v1096_v40 }
 0x27b   : > { %v1053_v41 = vpop.f32.mrf.mxu3 }
 0x27c   : > { %v1054_v42 = vadd.f32 %v2093_v58, %v1053_v41 }
 0x27d   : > { %v1100_v43 = vpop.f32.mrf.mxu0 }
 0x27e   : > { %v1098_v44 = vadd.f32 %v1097_v38, %v1054_v42 }
 0x280   : > { %1128 = vst [vmem:[%s2098_s25 + $0x18] sm:$0xff] %v1098_v44 }
 0x283   : > { %v1056_v45 = vpop.f32.mrf.mxu3 }
 0x284   : > { %v1057_v46 = vadd.f32 %v2093_v58, %v1056_v45 }
 0x285   : > { %v1102_v47 = vpop.f32.mrf.mxu0 }
 0x286   : > { %v1101_v39 = vadd.f32 %v1100_v43, %v1057_v46 }
 0x288   : > { %1129 = vst [vmem:[%s2098_s25 + $0x20] sm:$0xff] %v1101_v39 }
 0x28b   : > { %v1058_v48 = vpop.f32.mrf.mxu3 }
 0x28c   : > { %v1059_v49 = vadd.f32 %v2093_v58, %v1058_v48 }
 0x28d   : > { %v1105_v50 = vpop.f32.mrf.mxu0 }
 0x28e   : > { %v1103_v51 = vadd.f32 %v1102_v47, %v1059_v49 }
 0x290   : > { %1130 = vst [vmem:[%s2098_s25 + $0x28] sm:$0xff] %v1103_v51 }
 0x293   : > { %v1061_v52 = vpop.f32.mrf.mxu3 }
 0x294   : > { %v1062_v53 = vadd.f32 %v2093_v58, %v1061_v52 }
 0x295   : > { %v1107_v55 = vpop.f32.mrf.mxu0 }
 0x296   : > { %v1106_v57 = vadd.f32 %v1105_v50, %v1062_v53 }
 0x298   : > { %1131 = vst [vmem:[%s2098_s25 + $0x30] sm:$0xff] %v1106_v57 }
 0x29b   : > { %v1063_v59 = vpop.f32.mrf.mxu3 }
 0x29c   : > { %v1064_v61 = vadd.f32 %v2093_v58, %v1063_v59 }
 0x29d   : > { %v1110_v63 = vpop.f32.mrf.mxu0 }
 0x29e   : > { %v1108_v0 = vadd.f32 %v1107_v55, %v1064_v61 }
 0x2a0   : > { %1132 = vst [vmem:[%s2098_s25 + $0x38] sm:$0xff] %v1108_v0 }
 0x2a3   : > { %v1066_v1 = vpop.f32.mrf.mxu3 }
 0x2a4   : > { %v1067_v2 = vadd.f32 %v2093_v58, %v1066_v1 }
 0x2a5   : > { %v1112_v3 = vpop.f32.mrf.mxu0 }
 0x2a6   : > { %v1111_v4 = vadd.f32 %v1110_v63, %v1067_v2 }
 0x2a8   : > { %1133 = vst [vmem:[%s2098_s25 + $0x40] sm:$0xff] %v1111_v4 }
 0x2ab   : > { %v1068_v5 = vpop.f32.mrf.mxu3 }
 0x2ac   : > { %v1069_v6 = vadd.f32 %v2093_v58, %v1068_v5 }
 0x2ad   : > { %v1115_v8 = vpop.f32.mrf.mxu0 }
 0x2ae   : > { %v1113_v7 = vadd.f32 %v1112_v3, %v1069_v6 }
 0x2b0   : > { %1134 = vst [vmem:[%s2098_s25 + $0x48] sm:$0xff] %v1113_v7 }
 0x2b3   : > { %v1071_v9 = vpop.f32.mrf.mxu3 }
 0x2b4   : > { %v1072_v10 = vadd.f32 %v2093_v58, %v1071_v9 }
 0x2b5   : > { %v1117_v12 = vpop.f32.mrf.mxu0 }
 0x2b6   : > { %v1116_v11 = vadd.f32 %v1115_v8, %v1072_v10 }
 0x2b8   : > { %1135 = vst [vmem:[%s2098_s25 + $0x50] sm:$0xff] %v1116_v11 }
 0x2bb   : > { %v1073_v13 = vpop.f32.mrf.mxu3 }
 0x2bc   : > { %v1074_v14 = vadd.f32 %v2093_v58, %v1073_v13 }
 0x2bd   : > { %v1120_v16 = vpop.f32.mrf.mxu0 }
 0x2be   : > { %v1118_v15 = vadd.f32 %v1117_v12, %v1074_v14 }
 0x2c0   : > { %1136 = vst [vmem:[%s2098_s25 + $0x58] sm:$0xff] %v1118_v15 }
 0x2c3   : > { %v1076_v17 = vpop.f32.mrf.mxu3 }
 0x2c4   : > { %v1077_v18 = vadd.f32 %v2093_v58, %v1076_v17 }
 0x2c5   : > { %v1122_v22 = vpop.f32.mrf.mxu0 }
 0x2c6   : > { %v1121_v19 = vadd.f32 %v1120_v16, %v1077_v18 }
 0x2c8   : > { %1137 = vst [vmem:[%s2098_s25 + $0x60] sm:$0xff] %v1121_v19 }
 0x2cb   : > { %v1078_v20 = vpop.f32.mrf.mxu3 }
 0x2cc   : > { %v1079_v21 = vadd.f32 %v2093_v58, %v1078_v20 }
 0x2ce   : > { %v1123_v23 = vadd.f32 %v1122_v22, %v1079_v21 }
 0x2d0   : > { %1138 = vst [vmem:[%s2098_s25 + $0x68] sm:$0xff] %v1123_v23 }
 0x2d1   : > { %1654 = shalt.err (!%p1651_p8)
}
 0x2d2   : > { %s1704_s16 = smov 128   ;;  %s1705_s25 = smov 8  }
 0x2d3   : > { %1467 = dma.vmem_to_hbm [thread:$0]  (%p1794_p5), %s1153_s21, 1792, %s1155_s24, %s1140_s13, %s1704_s16, %s1704_s16, %s1705_s25  }
 0x2d4 PF: > { %p1489_p9 = scmp.ge.s32.totalorder %s1697_s12, 2  ;;  %s1169_s28 = sand.u32 1, %s1685_s30  }
 0x2d5   : > { %s1170_s1 = scalar_lea.sflag [#allocation4], %s1169_s28 }
 0x2d6   : > { %p1480_p10 = pnand %p1489_p9, %p1798_p6 }
 0x2d8   : > { %p1481_p11 = pneg %p1480_p10 }
 0x2da   : > { %1680 = dma.done.wait (%p1481_p11), %s1170_s1, 1792  }
 0x2db   : > { %1682 = vsyncadd (%p1481_p11), %s1170_s1, 4294965504  ;;  %p21_p12 = scmp.ge.s32.totalorder %s1781_s15, 4   ;;  %s2179_s30 = smov %s1689_s10 }
 0x2dc   : > { %s2180_s10 = smov %s1693_s11  ;;  %s2181_s11 = smov %s1792_s18 }
 0x2dd   : > { %s2182_s12 = smov %s1781_s15  ;;  %23 = sbr.rel (!%p21_p12) target bundleno = 8 (0x8), region = 105 }
 0x2e2   :  { %1176 = vsyncpa [#allocation3], 1 }
 0x2e3   :  { %1178 = vsyncpa [#allocation3 + $0x1], 1 }
 0x2e4   :  { %1179 = vsyncpa [#allocation6], 1 }
 0x2e5   :  { %1180 = vsyncpa [#allocation4], 1 }
 0x2e6   :  { %1182 = vsyncpa [#allocation4 + $0x1], 1 }

</bundles_post_ra>
